<compile_context>
chip_gen: v6e
topology: v6e:2x2x1
jax: 0.10.0
libtpu: 0.0.40
codegen_flags: <defaults>
</compile_context>

<pallas_src>
import jax
import jax.numpy as jnp
from jax.experimental import pallas as pl
from jax.experimental.pallas import tpu as pltpu

HORIZON = 7


def lstm_city_kernel(x_ref,      # (T, Bt, In)   time-major value column
                     emb_ref,    # (Bt, E)       city embedding per batch row
                     wih0v_ref,  # (In, 4H)      layer-0 value-column weights
                     wih0e_ref,  # (E, 4H)       layer-0 embedding-column weights
                     b0_ref,     # (1, 4H)       layer-0 fused bias (b_ih + b_hh)
                     whh0_ref,   # (H, 4H)
                     wih1_ref,   # (H, 4H)
                     whh1_ref,   # (H, 4H)
                     b1_ref,     # (1, 4H)       layer-1 fused bias
                     wfc_ref,    # (H, horizon)
                     bfc_ref,    # (1, horizon)
                     out_ref,    # (Bt, horizon)
                     z0_scr):    # (T, Bt, 4H)   VMEM scratch: hoisted layer-0 input slab
    f32 = jnp.float32
    T, Bt, In = x_ref.shape
    H = whh0_ref.shape[0]
    G = 4 * H

    # ---- hoisted input-side work (independent of the h/c recurrence) --------
    # Layer-0 "constant" part: embedding projection + fused bias, once per batch.
    z0_const = (jnp.dot(emb_ref[...], wih0e_ref[...], preferred_element_type=f32)
                + b0_ref[...])                                    # (Bt, 4H)
    # Full layer-0 pre-activation (minus the recurrent term) for all T steps,
    # written to VMEM scratch so the unrolled recurrence doesn't pin its vregs.
    for t in range(T):
        xv = x_ref[t]                                             # (Bt, In)
        if In == 1:
            xp = xv * wih0v_ref[...]          # (Bt,1)*(1,4H): VPU broadcast-mult
        else:
            xp = jnp.dot(xv, wih0v_ref[...], preferred_element_type=f32)
        z0_scr[t] = xp + z0_const                                 # (Bt, 4H)

    # Hoist the layer-1 bias broadcast (no per-step broadcast_in_dim).
    b1_full = jnp.broadcast_to(b1_ref[...], (Bt, G))              # (Bt, 4H)

    # Small weights pinned in vregs (12 vregs total at H=32). If the bundle
    # dump shows spills at larger B_tile, move these loads into the loop.
    w_hh0 = whh0_ref[...]
    w_ih1 = wih1_ref[...]
    w_hh1 = whh1_ref[...]

    def gates(z, c_prev):
        # One full-width sigmoid pass over the whole (Bt,4H) slab, then slice.
        s = jax.nn.sigmoid(z)
        i = s[:, 0 * H:1 * H]
        f = s[:, 1 * H:2 * H]
        o = s[:, 3 * H:4 * H]
        g = jnp.tanh(z[:, 2 * H:3 * H])
        c_new = f * c_prev + i * g
        h_new = o * jnp.tanh(c_new)
        return h_new, c_new

    zeros_bh = jnp.zeros((Bt, H), f32)
    h0, c0, h1, c1 = zeros_bh, zeros_bh, zeros_bh, zeros_bh

    # Fully unrolled recurrence: T is small and static.  Layer-1 of step t is
    # only consumed by layer-1 of step t+1, so it trails off the layer-0
    # critical path and overlaps with layer-0 of step t+1.
    for t in range(T):
        # Layer 0: hoisted input slab + recurrent matmul (the serial path).
        z0 = z0_scr[t] + jnp.dot(h0, w_hh0, preferred_element_type=f32)
        h0, c0 = gates(z0, c0)
        # Layer 1: trails (depends on new h0 and previous h1 only).
        z1 = (jnp.dot(h0, w_ih1, preferred_element_type=f32)
              + jnp.dot(h1, w_hh1, preferred_element_type=f32)
              + b1_full)
        h1, c1 = gates(z1, c1)

    # Final fc on the last timestep's top-layer hidden state.
    # (horizon=7 is lane-sparse -> masked vst; negligible at these sizes.)
    out_ref[...] = (jnp.dot(h1, wfc_ref[...], preferred_element_type=f32)
                    + bfc_ref[...])


def init_params(key, input_size=1, hidden_size=32, num_cities=100,
                embedding_dim=10, horizon=HORIZON):
    ks = jax.random.split(key, 11)
    D0 = input_size + embedding_dim
    H = hidden_size
    scale = 1.0 / float(H) ** 0.5

    def u(k, shape):
        return jax.random.uniform(k, shape, jnp.float32, -scale, scale)

    return dict(
        emb=jax.random.normal(ks[0], (num_cities, embedding_dim), jnp.float32),
        w_ih0=u(ks[1], (D0, 4 * H)),
        w_hh0=u(ks[2], (H, 4 * H)),
        b0=u(ks[3], (1, 4 * H)) + u(ks[4], (1, 4 * H)),   # b_ih + b_hh fused
        w_ih1=u(ks[5], (H, 4 * H)),
        w_hh1=u(ks[6], (H, 4 * H)),
        b1=u(ks[7], (1, 4 * H)) + u(ks[8], (1, 4 * H)),
        w_fc=u(ks[9], (H, horizon)),
        b_fc=u(ks[10], (1, horizon)),
    )


def lstm_city_forward(params, x, city_ids, *, b_tile_cap=32):
    """x: (B, T, input_size) float32, city_ids: (B,) int32 -> (B, horizon)."""
    B, T, input_size = x.shape
    E = params["emb"].shape[1]
    H = params["w_hh0"].shape[0]
    horizon = params["w_fc"].shape[1]
    G = 4 * H

    # Embedding gather stays as tiny XLA-side glue (data-dependent row gather).
    emb = params["emb"][city_ids]                                 # (B, E)

    # Batch tiling: pad to a multiple of the batch tile (>= 8 sublanes).
    # B_tile is capped to keep the per-block unrolled recurrence vreg-friendly;
    # sweep b_tile_cap when tuning for large batches.
    B_tile = min(max(8, ((B + 7) // 8) * 8), b_tile_cap)
    B_pad = ((B + B_tile - 1) // B_tile) * B_tile
    if B_pad != B:
        x = jnp.pad(x, ((0, B_pad - B), (0, 0), (0, 0)))
        emb = jnp.pad(emb, ((0, B_pad - B), (0, 0)))

    # Time-major layout so the kernel slices a contiguous (Bt, In) slab per step.
    x_tm = jnp.transpose(x, (1, 0, 2))                            # (T, B_pad, In)
    # TODO(synk): for very large batches, pack x as a lane-dense (T, B_tile)
    # slab (B_tile a multiple of 128) instead of lane-padding the size-1 column.

    # Split the layer-0 input weights into value / embedding columns.
    wih0 = params["w_ih0"]                                        # (In+E, 4H)
    wih0v = wih0[:input_size]                                     # (In, 4H)
    wih0e = wih0[input_size:]                                     # (E, 4H)

    grid = (B_pad // B_tile,)
    out = pl.pallas_call(
        lstm_city_kernel,
        out_shape=jax.ShapeDtypeStruct((B_pad, horizon), jnp.float32),
        grid=grid,
        in_specs=[
            pl.BlockSpec((T, B_tile, input_size), lambda j: (0, j, 0)),  # x
            pl.BlockSpec((B_tile, E), lambda j: (j, 0)),                 # emb
            pl.BlockSpec((input_size, G), lambda j: (0, 0)),             # wih0v
            pl.BlockSpec((E, G), lambda j: (0, 0)),                      # wih0e
            pl.BlockSpec((1, G), lambda j: (0, 0)),                      # b0
            pl.BlockSpec((H, G), lambda j: (0, 0)),                      # w_hh0
            pl.BlockSpec((H, G), lambda j: (0, 0)),                      # w_ih1
            pl.BlockSpec((H, G), lambda j: (0, 0)),                      # w_hh1
            pl.BlockSpec((1, G), lambda j: (0, 0)),                      # b1
            pl.BlockSpec((H, horizon), lambda j: (0, 0)),                # w_fc
            pl.BlockSpec((1, horizon), lambda j: (0, 0)),                # b_fc
        ],
        out_specs=pl.BlockSpec((B_tile, horizon), lambda j: (j, 0)),
        scratch_shapes=[pltpu.VMEM((T, B_tile, G), jnp.float32)],
        compiler_params=pltpu.CompilerParams(
            dimension_semantics=("parallel",)),
    )(x_tm, emb, wih0v, wih0e, params["b0"], params["w_hh0"],
      params["w_ih1"], params["w_hh1"], params["b1"],
      params["w_fc"], params["b_fc"])

    return out[:B]


def lstm_city_reference(params, x, city_ids):
    """Pure-JAX reference (same math as torch.nn.LSTM / Linear)."""
    B, T, _ = x.shape
    emb = params["emb"][city_ids]
    x_cat = jnp.concatenate(
        [x, jnp.broadcast_to(emb[:, None, :], (B, T, emb.shape[-1]))], axis=-1)
    H = params["w_hh0"].shape[0]

    def cell(x_t, h, c, w_ih, w_hh, b):
        z = x_t @ w_ih + h @ w_hh + b
        i = jax.nn.sigmoid(z[:, 0 * H:1 * H])
        f = jax.nn.sigmoid(z[:, 1 * H:2 * H])
        g = jnp.tanh(z[:, 2 * H:3 * H])
        o = jax.nn.sigmoid(z[:, 3 * H:4 * H])
        c_new = f * c + i * g
        return o * jnp.tanh(c_new), c_new

    def step(carry, x_t):
        h0, c0, h1, c1 = carry
        h0, c0 = cell(x_t, h0, c0, params["w_ih0"], params["w_hh0"], params["b0"])
        h1, c1 = cell(h0, h1, c1, params["w_ih1"], params["w_hh1"], params["b1"])
        return (h0, c0, h1, c1), None

    z = jnp.zeros((B, H), jnp.float32)
    (h0, c0, h1, c1), _ = jax.lax.scan(step, (z, z, z, z),
                                       jnp.transpose(x_cat, (1, 0, 2)))
    return h1 @ params["w_fc"] + params["b_fc"]


if __name__ == "__main__":
    key = jax.random.PRNGKey(0)
    k_p, k_x, k_c = jax.random.split(key, 3)

    B, T, INPUT_SIZE = 2, 8, 1
    HIDDEN, NUM_CITIES, EMB_DIM = 32, 100, 10

    params = init_params(k_p, input_size=INPUT_SIZE, hidden_size=HIDDEN,
                         num_cities=NUM_CITIES, embedding_dim=EMB_DIM,
                         horizon=HORIZON)
    x = jax.random.normal(k_x, (B, T, INPUT_SIZE), jnp.float32)
    city_ids = jax.random.randint(k_c, (B,), 0, NUM_CITIES, jnp.int32)

    out = lstm_city_forward(params, x, city_ids)
    out = jax.block_until_ready(out)
    assert out.shape == (B, HORIZON), out.shape

    ref = jax.block_until_ready(lstm_city_reference(params, x, city_ids))
    assert jnp.allclose(out, ref, atol=1e-4, rtol=1e-4), (out, ref)

    print("KERNEL_OK")
</pallas_src>

<mosaic_0001>
module attributes {stable_mosaic.version = 11 : i64} {
  func.func @lstm_city_kernel(%arg0: i32, %arg1: memref<8x8x1xf32, #tpu.memory_space<vmem>>, %arg2: memref<8x10xf32, #tpu.memory_space<vmem>>, %arg3: memref<1x128xf32, #tpu.memory_space<vmem>>, %arg4: memref<10x128xf32, #tpu.memory_space<vmem>>, %arg5: memref<1x128xf32, #tpu.memory_space<vmem>>, %arg6: memref<32x128xf32, #tpu.memory_space<vmem>>, %arg7: memref<32x128xf32, #tpu.memory_space<vmem>>, %arg8: memref<32x128xf32, #tpu.memory_space<vmem>>, %arg9: memref<1x128xf32, #tpu.memory_space<vmem>>, %arg10: memref<32x7xf32, #tpu.memory_space<vmem>>, %arg11: memref<1x7xf32, #tpu.memory_space<vmem>>, %arg12: memref<8x7xf32, #tpu.memory_space<vmem>>, %arg13: memref<8x8x128xf32, #tpu.memory_space<vmem>>) attributes {dimension_semantics = [#tpu.dimension_semantics<parallel>], iteration_bounds = array<i64: 1>, scalar_prefetch = 0 : i64, scratch_operands = 1 : i64, tpu.core_type = #tpu.core_type<tc>, window_params = [{transform_indices = @transform_0, window_bounds = array<i64: 8, 8, 1>}, {transform_indices = @transform_1, window_bounds = array<i64: 8, 10>}, {pipeline_mode = #tpu.pipeline_mode<synchronous>, transform_indices = @transform_2, window_bounds = array<i64: 1, 128>}, {pipeline_mode = #tpu.pipeline_mode<synchronous>, transform_indices = @transform_3, window_bounds = array<i64: 10, 128>}, {pipeline_mode = #tpu.pipeline_mode<synchronous>, transform_indices = @transform_4, window_bounds = array<i64: 1, 128>}, {pipeline_mode = #tpu.pipeline_mode<synchronous>, transform_indices = @transform_5, window_bounds = array<i64: 32, 128>}, {pipeline_mode = #tpu.pipeline_mode<synchronous>, transform_indices = @transform_6, window_bounds = array<i64: 32, 128>}, {pipeline_mode = #tpu.pipeline_mode<synchronous>, transform_indices = @transform_7, window_bounds = array<i64: 32, 128>}, {pipeline_mode = #tpu.pipeline_mode<synchronous>, transform_indices = @transform_8, window_bounds = array<i64: 1, 128>}, {pipeline_mode = #tpu.pipeline_mode<synchronous>, transform_indices = @transform_9, window_bounds = array<i64: 32, 7>}, {pipeline_mode = #tpu.pipeline_mode<synchronous>, transform_indices = @transform_10, window_bounds = array<i64: 1, 7>}, {transform_indices = @transform_11, window_bounds = array<i64: 8, 7>}]} {
    %c0 = arith.constant 0 : index
    %c0_0 = arith.constant 0 : index
    %0 = vector.load %arg2[%c0, %c0_0] : memref<8x10xf32, #tpu.memory_space<vmem>>, vector<8x10xf32>
    %c0_1 = arith.constant 0 : index
    %c0_2 = arith.constant 0 : index
    %1 = vector.load %arg4[%c0_1, %c0_2] : memref<10x128xf32, #tpu.memory_space<vmem>>, vector<10x128xf32>
    %cst = arith.constant dense<0.000000e+00> : vector<8x128xf32>
    %2 = tpu.matmul %0, %1, %cst {dimension_numbers = #tpu.dot_dimension_numbers<[1], [0], [0], [1], [0, 0, 1, 1], [], []>} : vector<8x10xf32>, vector<10x128xf32>, vector<8x128xf32> -> vector<8x128xf32>
    %c0_3 = arith.constant 0 : index
    %c0_4 = arith.constant 0 : index
    %3 = vector.load %arg5[%c0_3, %c0_4] : memref<1x128xf32, #tpu.memory_space<vmem>>, vector<1x128xf32>
    %4 = vector.broadcast %3 : vector<1x128xf32> to vector<8x128xf32>
    %5 = arith.addf %2, %4 : vector<8x128xf32>
    %c0_5 = arith.constant 0 : index
    %c0_6 = arith.constant 0 : index
    %c0_7 = arith.constant 0 : index
    %6 = vector.load %arg1[%c0_5, %c0_6, %c0_7] : memref<8x8x1xf32, #tpu.memory_space<vmem>>, vector<1x8x1xf32>
    %7 = vector.shape_cast %6 : vector<1x8x1xf32> to vector<8x1xf32>
    %c0_8 = arith.constant 0 : index
    %c0_9 = arith.constant 0 : index
    %8 = vector.load %arg3[%c0_8, %c0_9] : memref<1x128xf32, #tpu.memory_space<vmem>>, vector<1x128xf32>
    %9 = vector.broadcast %7 : vector<8x1xf32> to vector<8x128xf32>
    %10 = vector.broadcast %8 : vector<1x128xf32> to vector<8x128xf32>
    %11 = arith.mulf %9, %10 : vector<8x128xf32>
    %12 = arith.addf %11, %5 : vector<8x128xf32>
    %c0_10 = arith.constant 0 : index
    %c0_11 = arith.constant 0 : index
    %c0_12 = arith.constant 0 : index
    %13 = vector.load %arg13[%c0_10, %c0_11, %c0_12] : memref<8x8x128xf32, #tpu.memory_space<vmem>>, vector<1x8x128xf32>
    %14 = vector.shape_cast %13 : vector<1x8x128xf32> to vector<8x128xf32>
    %15 = vector.shape_cast %12 : vector<8x128xf32> to vector<1x8x128xf32>
    tpu.vector_store %arg13[%c0_10, %c0_11, %c0_12], %15 {strides = array<i32>} : memref<8x8x128xf32, #tpu.memory_space<vmem>>, vector<1x8x128xf32>,
    %c1 = arith.constant 1 : index
    %c0_13 = arith.constant 0 : index
    %c0_14 = arith.constant 0 : index
    %16 = vector.load %arg1[%c1, %c0_13, %c0_14] : memref<8x8x1xf32, #tpu.memory_space<vmem>>, vector<1x8x1xf32>
    %17 = vector.shape_cast %16 : vector<1x8x1xf32> to vector<8x1xf32>
    %c0_15 = arith.constant 0 : index
    %c0_16 = arith.constant 0 : index
    %18 = vector.load %arg3[%c0_15, %c0_16] : memref<1x128xf32, #tpu.memory_space<vmem>>, vector<1x128xf32>
    %19 = vector.broadcast %17 : vector<8x1xf32> to vector<8x128xf32>
    %20 = vector.broadcast %18 : vector<1x128xf32> to vector<8x128xf32>
    %21 = arith.mulf %19, %20 : vector<8x128xf32>
    %22 = arith.addf %21, %5 : vector<8x128xf32>
    %c1_17 = arith.constant 1 : index
    %c0_18 = arith.constant 0 : index
    %c0_19 = arith.constant 0 : index
    %23 = vector.load %arg13[%c1_17, %c0_18, %c0_19] : memref<8x8x128xf32, #tpu.memory_space<vmem>>, vector<1x8x128xf32>
    %24 = vector.shape_cast %23 : vector<1x8x128xf32> to vector<8x128xf32>
    %25 = vector.shape_cast %22 : vector<8x128xf32> to vector<1x8x128xf32>
    tpu.vector_store %arg13[%c1_17, %c0_18, %c0_19], %25 {strides = array<i32>} : memref<8x8x128xf32, #tpu.memory_space<vmem>>, vector<1x8x128xf32>,
    %c2 = arith.constant 2 : index
    %c0_20 = arith.constant 0 : index
    %c0_21 = arith.constant 0 : index
    %26 = vector.load %arg1[%c2, %c0_20, %c0_21] : memref<8x8x1xf32, #tpu.memory_space<vmem>>, vector<1x8x1xf32>
    %27 = vector.shape_cast %26 : vector<1x8x1xf32> to vector<8x1xf32>
    %c0_22 = arith.constant 0 : index
    %c0_23 = arith.constant 0 : index
    %28 = vector.load %arg3[%c0_22, %c0_23] : memref<1x128xf32, #tpu.memory_space<vmem>>, vector<1x128xf32>
    %29 = vector.broadcast %27 : vector<8x1xf32> to vector<8x128xf32>
    %30 = vector.broadcast %28 : vector<1x128xf32> to vector<8x128xf32>
    %31 = arith.mulf %29, %30 : vector<8x128xf32>
    %32 = arith.addf %31, %5 : vector<8x128xf32>
    %c2_24 = arith.constant 2 : index
    %c0_25 = arith.constant 0 : index
    %c0_26 = arith.constant 0 : index
    %33 = vector.load %arg13[%c2_24, %c0_25, %c0_26] : memref<8x8x128xf32, #tpu.memory_space<vmem>>, vector<1x8x128xf32>
    %34 = vector.shape_cast %33 : vector<1x8x128xf32> to vector<8x128xf32>
    %35 = vector.shape_cast %32 : vector<8x128xf32> to vector<1x8x128xf32>
    tpu.vector_store %arg13[%c2_24, %c0_25, %c0_26], %35 {strides = array<i32>} : memref<8x8x128xf32, #tpu.memory_space<vmem>>, vector<1x8x128xf32>,
    %c3 = arith.constant 3 : index
    %c0_27 = arith.constant 0 : index
    %c0_28 = arith.constant 0 : index
    %36 = vector.load %arg1[%c3, %c0_27, %c0_28] : memref<8x8x1xf32, #tpu.memory_space<vmem>>, vector<1x8x1xf32>
    %37 = vector.shape_cast %36 : vector<1x8x1xf32> to vector<8x1xf32>
    %c0_29 = arith.constant 0 : index
    %c0_30 = arith.constant 0 : index
    %38 = vector.load %arg3[%c0_29, %c0_30] : memref<1x128xf32, #tpu.memory_space<vmem>>, vector<1x128xf32>
    %39 = vector.broadcast %37 : vector<8x1xf32> to vector<8x128xf32>
    %40 = vector.broadcast %38 : vector<1x128xf32> to vector<8x128xf32>
    %41 = arith.mulf %39, %40 : vector<8x128xf32>
    %42 = arith.addf %41, %5 : vector<8x128xf32>
    %c3_31 = arith.constant 3 : index
    %c0_32 = arith.constant 0 : index
    %c0_33 = arith.constant 0 : index
    %43 = vector.load %arg13[%c3_31, %c0_32, %c0_33] : memref<8x8x128xf32, #tpu.memory_space<vmem>>, vector<1x8x128xf32>
    %44 = vector.shape_cast %43 : vector<1x8x128xf32> to vector<8x128xf32>
    %45 = vector.shape_cast %42 : vector<8x128xf32> to vector<1x8x128xf32>
    tpu.vector_store %arg13[%c3_31, %c0_32, %c0_33], %45 {strides = array<i32>} : memref<8x8x128xf32, #tpu.memory_space<vmem>>, vector<1x8x128xf32>,
    %c4 = arith.constant 4 : index
    %c0_34 = arith.constant 0 : index
    %c0_35 = arith.constant 0 : index
    %46 = vector.load %arg1[%c4, %c0_34, %c0_35] : memref<8x8x1xf32, #tpu.memory_space<vmem>>, vector<1x8x1xf32>
    %47 = vector.shape_cast %46 : vector<1x8x1xf32> to vector<8x1xf32>
    %c0_36 = arith.constant 0 : index
    %c0_37 = arith.constant 0 : index
    %48 = vector.load %arg3[%c0_36, %c0_37] : memref<1x128xf32, #tpu.memory_space<vmem>>, vector<1x128xf32>
    %49 = vector.broadcast %47 : vector<8x1xf32> to vector<8x128xf32>
    %50 = vector.broadcast %48 : vector<1x128xf32> to vector<8x128xf32>
    %51 = arith.mulf %49, %50 : vector<8x128xf32>
    %52 = arith.addf %51, %5 : vector<8x128xf32>
    %c4_38 = arith.constant 4 : index
    %c0_39 = arith.constant 0 : index
    %c0_40 = arith.constant 0 : index
    %53 = vector.load %arg13[%c4_38, %c0_39, %c0_40] : memref<8x8x128xf32, #tpu.memory_space<vmem>>, vector<1x8x128xf32>
    %54 = vector.shape_cast %53 : vector<1x8x128xf32> to vector<8x128xf32>
    %55 = vector.shape_cast %52 : vector<8x128xf32> to vector<1x8x128xf32>
    tpu.vector_store %arg13[%c4_38, %c0_39, %c0_40], %55 {strides = array<i32>} : memref<8x8x128xf32, #tpu.memory_space<vmem>>, vector<1x8x128xf32>,
    %c5 = arith.constant 5 : index
    %c0_41 = arith.constant 0 : index
    %c0_42 = arith.constant 0 : index
    %56 = vector.load %arg1[%c5, %c0_41, %c0_42] : memref<8x8x1xf32, #tpu.memory_space<vmem>>, vector<1x8x1xf32>
    %57 = vector.shape_cast %56 : vector<1x8x1xf32> to vector<8x1xf32>
    %c0_43 = arith.constant 0 : index
    %c0_44 = arith.constant 0 : index
    %58 = vector.load %arg3[%c0_43, %c0_44] : memref<1x128xf32, #tpu.memory_space<vmem>>, vector<1x128xf32>
    %59 = vector.broadcast %57 : vector<8x1xf32> to vector<8x128xf32>
    %60 = vector.broadcast %58 : vector<1x128xf32> to vector<8x128xf32>
    %61 = arith.mulf %59, %60 : vector<8x128xf32>
    %62 = arith.addf %61, %5 : vector<8x128xf32>
    %c5_45 = arith.constant 5 : index
    %c0_46 = arith.constant 0 : index
    %c0_47 = arith.constant 0 : index
    %63 = vector.load %arg13[%c5_45, %c0_46, %c0_47] : memref<8x8x128xf32, #tpu.memory_space<vmem>>, vector<1x8x128xf32>
    %64 = vector.shape_cast %63 : vector<1x8x128xf32> to vector<8x128xf32>
    %65 = vector.shape_cast %62 : vector<8x128xf32> to vector<1x8x128xf32>
    tpu.vector_store %arg13[%c5_45, %c0_46, %c0_47], %65 {strides = array<i32>} : memref<8x8x128xf32, #tpu.memory_space<vmem>>, vector<1x8x128xf32>,
    %c6 = arith.constant 6 : index
    %c0_48 = arith.constant 0 : index
    %c0_49 = arith.constant 0 : index
    %66 = vector.load %arg1[%c6, %c0_48, %c0_49] : memref<8x8x1xf32, #tpu.memory_space<vmem>>, vector<1x8x1xf32>
    %67 = vector.shape_cast %66 : vector<1x8x1xf32> to vector<8x1xf32>
    %c0_50 = arith.constant 0 : index
    %c0_51 = arith.constant 0 : index
    %68 = vector.load %arg3[%c0_50, %c0_51] : memref<1x128xf32, #tpu.memory_space<vmem>>, vector<1x128xf32>
    %69 = vector.broadcast %67 : vector<8x1xf32> to vector<8x128xf32>
    %70 = vector.broadcast %68 : vector<1x128xf32> to vector<8x128xf32>
    %71 = arith.mulf %69, %70 : vector<8x128xf32>
    %72 = arith.addf %71, %5 : vector<8x128xf32>
    %c6_52 = arith.constant 6 : index
    %c0_53 = arith.constant 0 : index
    %c0_54 = arith.constant 0 : index
    %73 = vector.load %arg13[%c6_52, %c0_53, %c0_54] : memref<8x8x128xf32, #tpu.memory_space<vmem>>, vector<1x8x128xf32>
    %74 = vector.shape_cast %73 : vector<1x8x128xf32> to vector<8x128xf32>
    %75 = vector.shape_cast %72 : vector<8x128xf32> to vector<1x8x128xf32>
    tpu.vector_store %arg13[%c6_52, %c0_53, %c0_54], %75 {strides = array<i32>} : memref<8x8x128xf32, #tpu.memory_space<vmem>>, vector<1x8x128xf32>,
    %c7 = arith.constant 7 : index
    %c0_55 = arith.constant 0 : index
    %c0_56 = arith.constant 0 : index
    %76 = vector.load %arg1[%c7, %c0_55, %c0_56] : memref<8x8x1xf32, #tpu.memory_space<vmem>>, vector<1x8x1xf32>
    %77 = vector.shape_cast %76 : vector<1x8x1xf32> to vector<8x1xf32>
    %c0_57 = arith.constant 0 : index
    %c0_58 = arith.constant 0 : index
    %78 = vector.load %arg3[%c0_57, %c0_58] : memref<1x128xf32, #tpu.memory_space<vmem>>, vector<1x128xf32>
    %79 = vector.broadcast %77 : vector<8x1xf32> to vector<8x128xf32>
    %80 = vector.broadcast %78 : vector<1x128xf32> to vector<8x128xf32>
    %81 = arith.mulf %79, %80 : vector<8x128xf32>
    %82 = arith.addf %81, %5 : vector<8x128xf32>
    %c7_59 = arith.constant 7 : index
    %c0_60 = arith.constant 0 : index
    %c0_61 = arith.constant 0 : index
    %83 = vector.load %arg13[%c7_59, %c0_60, %c0_61] : memref<8x8x128xf32, #tpu.memory_space<vmem>>, vector<1x8x128xf32>
    %84 = vector.shape_cast %83 : vector<1x8x128xf32> to vector<8x128xf32>
    %85 = vector.shape_cast %82 : vector<8x128xf32> to vector<1x8x128xf32>
    tpu.vector_store %arg13[%c7_59, %c0_60, %c0_61], %85 {strides = array<i32>} : memref<8x8x128xf32, #tpu.memory_space<vmem>>, vector<1x8x128xf32>,
    %c0_62 = arith.constant 0 : index
    %c0_63 = arith.constant 0 : index
    %86 = vector.load %arg9[%c0_62, %c0_63] : memref<1x128xf32, #tpu.memory_space<vmem>>, vector<1x128xf32>
    %87 = vector.shape_cast %86 : vector<1x128xf32> to vector<1x128xf32>
    %88 = vector.broadcast %87 : vector<1x128xf32> to vector<8x128xf32>
    %c0_64 = arith.constant 0 : index
    %c0_65 = arith.constant 0 : index
    %89 = vector.load %arg6[%c0_64, %c0_65] : memref<32x128xf32, #tpu.memory_space<vmem>>, vector<32x128xf32>
    %c0_66 = arith.constant 0 : index
    %c0_67 = arith.constant 0 : index
    %90 = vector.load %arg7[%c0_66, %c0_67] : memref<32x128xf32, #tpu.memory_space<vmem>>, vector<32x128xf32>
    %c0_68 = arith.constant 0 : index
    %c0_69 = arith.constant 0 : index
    %91 = vector.load %arg8[%c0_68, %c0_69] : memref<32x128xf32, #tpu.memory_space<vmem>>, vector<32x128xf32>
    %cst_70 = arith.constant 0.000000e+00 : f32
    %92 = vector.broadcast %cst_70 : f32 to vector<8x32xf32>
    %c0_71 = arith.constant 0 : index
    %c0_72 = arith.constant 0 : index
    %c0_73 = arith.constant 0 : index
    %93 = vector.load %arg13[%c0_71, %c0_72, %c0_73] : memref<8x8x128xf32, #tpu.memory_space<vmem>>, vector<1x8x128xf32>
    %94 = vector.shape_cast %93 : vector<1x8x128xf32> to vector<8x128xf32>
    %cst_74 = arith.constant dense<0.000000e+00> : vector<8x128xf32>
    %95 = tpu.matmul %92, %89, %cst_74 {dimension_numbers = #tpu.dot_dimension_numbers<[1], [0], [0], [1], [0, 0, 1, 1], [], []>} : vector<8x32xf32>, vector<32x128xf32>, vector<8x128xf32> -> vector<8x128xf32>
    %96 = arith.addf %94, %95 : vector<8x128xf32>
    %97 = arith.negf %96 : vector<8x128xf32>
    %98 = math.exp %97 : vector<8x128xf32>
    %cst_75 = arith.constant 1.000000e+00 : f32
    %99 = vector.broadcast %cst_75 : f32 to vector<8x128xf32>
    %100 = arith.addf %99, %98 : vector<8x128xf32>
    %101 = arith.divf %99, %100 : vector<8x128xf32>
    %102 = vector.extract_strided_slice %101 {offsets = [0, 0], sizes = [8, 32], strides = [1, 1]} : vector<8x128xf32> to vector<8x32xf32>
    %103 = vector.extract_strided_slice %101 {offsets = [0, 32], sizes = [8, 32], strides = [1, 1]} : vector<8x128xf32> to vector<8x32xf32>
    %104 = vector.extract_strided_slice %101 {offsets = [0, 96], sizes = [8, 32], strides = [1, 1]} : vector<8x128xf32> to vector<8x32xf32>
    %105 = vector.extract_strided_slice %96 {offsets = [0, 64], sizes = [8, 32], strides = [1, 1]} : vector<8x128xf32> to vector<8x32xf32>
    %106 = math.tanh %105 : vector<8x32xf32>
    %107 = arith.mulf %103, %92 : vector<8x32xf32>
    %108 = arith.mulf %102, %106 : vector<8x32xf32>
    %109 = arith.addf %107, %108 : vector<8x32xf32>
    %110 = math.tanh %109 : vector<8x32xf32>
    %111 = arith.mulf %104, %110 : vector<8x32xf32>
    %cst_76 = arith.constant dense<0.000000e+00> : vector<8x128xf32>
    %112 = tpu.matmul %111, %90, %cst_76 {dimension_numbers = #tpu.dot_dimension_numbers<[1], [0], [0], [1], [0, 0, 1, 1], [], []>} : vector<8x32xf32>, vector<32x128xf32>, vector<8x128xf32> -> vector<8x128xf32>
    %cst_77 = arith.constant dense<0.000000e+00> : vector<8x128xf32>
    %113 = tpu.matmul %92, %91, %cst_77 {dimension_numbers = #tpu.dot_dimension_numbers<[1], [0], [0], [1], [0, 0, 1, 1], [], []>} : vector<8x32xf32>, vector<32x128xf32>, vector<8x128xf32> -> vector<8x128xf32>
    %114 = arith.addf %112, %113 : vector<8x128xf32>
    %115 = arith.addf %114, %88 : vector<8x128xf32>
    %116 = arith.negf %115 : vector<8x128xf32>
    %117 = math.exp %116 : vector<8x128xf32>
    %cst_78 = arith.constant 1.000000e+00 : f32
    %118 = vector.broadcast %cst_78 : f32 to vector<8x128xf32>
    %119 = arith.addf %118, %117 : vector<8x128xf32>
    %120 = arith.divf %118, %119 : vector<8x128xf32>
    %121 = vector.extract_strided_slice %120 {offsets = [0, 0], sizes = [8, 32], strides = [1, 1]} : vector<8x128xf32> to vector<8x32xf32>
    %122 = vector.extract_strided_slice %120 {offsets = [0, 32], sizes = [8, 32], strides = [1, 1]} : vector<8x128xf32> to vector<8x32xf32>
    %123 = vector.extract_strided_slice %120 {offsets = [0, 96], sizes = [8, 32], strides = [1, 1]} : vector<8x128xf32> to vector<8x32xf32>
    %124 = vector.extract_strided_slice %115 {offsets = [0, 64], sizes = [8, 32], strides = [1, 1]} : vector<8x128xf32> to vector<8x32xf32>
    %125 = math.tanh %124 : vector<8x32xf32>
    %126 = arith.mulf %122, %92 : vector<8x32xf32>
    %127 = arith.mulf %121, %125 : vector<8x32xf32>
    %128 = arith.addf %126, %127 : vector<8x32xf32>
    %129 = math.tanh %128 : vector<8x32xf32>
    %130 = arith.mulf %123, %129 : vector<8x32xf32>
    %c1_79 = arith.constant 1 : index
    %c0_80 = arith.constant 0 : index
    %c0_81 = arith.constant 0 : index
    %131 = vector.load %arg13[%c1_79, %c0_80, %c0_81] : memref<8x8x128xf32, #tpu.memory_space<vmem>>, vector<1x8x128xf32>
    %132 = vector.shape_cast %131 : vector<1x8x128xf32> to vector<8x128xf32>
    %cst_82 = arith.constant dense<0.000000e+00> : vector<8x128xf32>
    %133 = tpu.matmul %111, %89, %cst_82 {dimension_numbers = #tpu.dot_dimension_numbers<[1], [0], [0], [1], [0, 0, 1, 1], [], []>} : vector<8x32xf32>, vector<32x128xf32>, vector<8x128xf32> -> vector<8x128xf32>
    %134 = arith.addf %132, %133 : vector<8x128xf32>
    %135 = arith.negf %134 : vector<8x128xf32>
    %136 = math.exp %135 : vector<8x128xf32>
    %cst_83 = arith.constant 1.000000e+00 : f32
    %137 = vector.broadcast %cst_83 : f32 to vector<8x128xf32>
    %138 = arith.addf %137, %136 : vector<8x128xf32>
    %139 = arith.divf %137, %138 : vector<8x128xf32>
    %140 = vector.extract_strided_slice %139 {offsets = [0, 0], sizes = [8, 32], strides = [1, 1]} : vector<8x128xf32> to vector<8x32xf32>
    %141 = vector.extract_strided_slice %139 {offsets = [0, 32], sizes = [8, 32], strides = [1, 1]} : vector<8x128xf32> to vector<8x32xf32>
    %142 = vector.extract_strided_slice %139 {offsets = [0, 96], sizes = [8, 32], strides = [1, 1]} : vector<8x128xf32> to vector<8x32xf32>
    %143 = vector.extract_strided_slice %134 {offsets = [0, 64], sizes = [8, 32], strides = [1, 1]} : vector<8x128xf32> to vector<8x32xf32>
    %144 = math.tanh %143 : vector<8x32xf32>
    %145 = arith.mulf %141, %109 : vector<8x32xf32>
    %146 = arith.mulf %140, %144 : vector<8x32xf32>
    %147 = arith.addf %145, %146 : vector<8x32xf32>
    %148 = math.tanh %147 : vector<8x32xf32>
    %149 = arith.mulf %142, %148 : vector<8x32xf32>
    %cst_84 = arith.constant dense<0.000000e+00> : vector<8x128xf32>
    %150 = tpu.matmul %149, %90, %cst_84 {dimension_numbers = #tpu.dot_dimension_numbers<[1], [0], [0], [1], [0, 0, 1, 1], [], []>} : vector<8x32xf32>, vector<32x128xf32>, vector<8x128xf32> -> vector<8x128xf32>
    %cst_85 = arith.constant dense<0.000000e+00> : vector<8x128xf32>
    %151 = tpu.matmul %130, %91, %cst_85 {dimension_numbers = #tpu.dot_dimension_numbers<[1], [0], [0], [1], [0, 0, 1, 1], [], []>} : vector<8x32xf32>, vector<32x128xf32>, vector<8x128xf32> -> vector<8x128xf32>
    %152 = arith.addf %150, %151 : vector<8x128xf32>
    %153 = arith.addf %152, %88 : vector<8x128xf32>
    %154 = arith.negf %153 : vector<8x128xf32>
    %155 = math.exp %154 : vector<8x128xf32>
    %cst_86 = arith.constant 1.000000e+00 : f32
    %156 = vector.broadcast %cst_86 : f32 to vector<8x128xf32>
    %157 = arith.addf %156, %155 : vector<8x128xf32>
    %158 = arith.divf %156, %157 : vector<8x128xf32>
    %159 = vector.extract_strided_slice %158 {offsets = [0, 0], sizes = [8, 32], strides = [1, 1]} : vector<8x128xf32> to vector<8x32xf32>
    %160 = vector.extract_strided_slice %158 {offsets = [0, 32], sizes = [8, 32], strides = [1, 1]} : vector<8x128xf32> to vector<8x32xf32>
    %161 = vector.extract_strided_slice %158 {offsets = [0, 96], sizes = [8, 32], strides = [1, 1]} : vector<8x128xf32> to vector<8x32xf32>
    %162 = vector.extract_strided_slice %153 {offsets = [0, 64], sizes = [8, 32], strides = [1, 1]} : vector<8x128xf32> to vector<8x32xf32>
    %163 = math.tanh %162 : vector<8x32xf32>
    %164 = arith.mulf %160, %128 : vector<8x32xf32>
    %165 = arith.mulf %159, %163 : vector<8x32xf32>
    %166 = arith.addf %164, %165 : vector<8x32xf32>
    %167 = math.tanh %166 : vector<8x32xf32>
    %168 = arith.mulf %161, %167 : vector<8x32xf32>
    %c2_87 = arith.constant 2 : index
    %c0_88 = arith.constant 0 : index
    %c0_89 = arith.constant 0 : index
    %169 = vector.load %arg13[%c2_87, %c0_88, %c0_89] : memref<8x8x128xf32, #tpu.memory_space<vmem>>, vector<1x8x128xf32>
    %170 = vector.shape_cast %169 : vector<1x8x128xf32> to vector<8x128xf32>
    %cst_90 = arith.constant dense<0.000000e+00> : vector<8x128xf32>
    %171 = tpu.matmul %149, %89, %cst_90 {dimension_numbers = #tpu.dot_dimension_numbers<[1], [0], [0], [1], [0, 0, 1, 1], [], []>} : vector<8x32xf32>, vector<32x128xf32>, vector<8x128xf32> -> vector<8x128xf32>
    %172 = arith.addf %170, %171 : vector<8x128xf32>
    %173 = arith.negf %172 : vector<8x128xf32>
    %174 = math.exp %173 : vector<8x128xf32>
    %cst_91 = arith.constant 1.000000e+00 : f32
    %175 = vector.broadcast %cst_91 : f32 to vector<8x128xf32>
    %176 = arith.addf %175, %174 : vector<8x128xf32>
    %177 = arith.divf %175, %176 : vector<8x128xf32>
    %178 = vector.extract_strided_slice %177 {offsets = [0, 0], sizes = [8, 32], strides = [1, 1]} : vector<8x128xf32> to vector<8x32xf32>
    %179 = vector.extract_strided_slice %177 {offsets = [0, 32], sizes = [8, 32], strides = [1, 1]} : vector<8x128xf32> to vector<8x32xf32>
    %180 = vector.extract_strided_slice %177 {offsets = [0, 96], sizes = [8, 32], strides = [1, 1]} : vector<8x128xf32> to vector<8x32xf32>
    %181 = vector.extract_strided_slice %172 {offsets = [0, 64], sizes = [8, 32], strides = [1, 1]} : vector<8x128xf32> to vector<8x32xf32>
    %182 = math.tanh %181 : vector<8x32xf32>
    %183 = arith.mulf %179, %147 : vector<8x32xf32>
    %184 = arith.mulf %178, %182 : vector<8x32xf32>
    %185 = arith.addf %183, %184 : vector<8x32xf32>
    %186 = math.tanh %185 : vector<8x32xf32>
    %187 = arith.mulf %180, %186 : vector<8x32xf32>
    %cst_92 = arith.constant dense<0.000000e+00> : vector<8x128xf32>
    %188 = tpu.matmul %187, %90, %cst_92 {dimension_numbers = #tpu.dot_dimension_numbers<[1], [0], [0], [1], [0, 0, 1, 1], [], []>} : vector<8x32xf32>, vector<32x128xf32>, vector<8x128xf32> -> vector<8x128xf32>
    %cst_93 = arith.constant dense<0.000000e+00> : vector<8x128xf32>
    %189 = tpu.matmul %168, %91, %cst_93 {dimension_numbers = #tpu.dot_dimension_numbers<[1], [0], [0], [1], [0, 0, 1, 1], [], []>} : vector<8x32xf32>, vector<32x128xf32>, vector<8x128xf32> -> vector<8x128xf32>
    %190 = arith.addf %188, %189 : vector<8x128xf32>
    %191 = arith.addf %190, %88 : vector<8x128xf32>
    %192 = arith.negf %191 : vector<8x128xf32>
    %193 = math.exp %192 : vector<8x128xf32>
    %cst_94 = arith.constant 1.000000e+00 : f32
    %194 = vector.broadcast %cst_94 : f32 to vector<8x128xf32>
    %195 = arith.addf %194, %193 : vector<8x128xf32>
    %196 = arith.divf %194, %195 : vector<8x128xf32>
    %197 = vector.extract_strided_slice %196 {offsets = [0, 0], sizes = [8, 32], strides = [1, 1]} : vector<8x128xf32> to vector<8x32xf32>
    %198 = vector.extract_strided_slice %196 {offsets = [0, 32], sizes = [8, 32], strides = [1, 1]} : vector<8x128xf32> to vector<8x32xf32>
    %199 = vector.extract_strided_slice %196 {offsets = [0, 96], sizes = [8, 32], strides = [1, 1]} : vector<8x128xf32> to vector<8x32xf32>
    %200 = vector.extract_strided_slice %191 {offsets = [0, 64], sizes = [8, 32], strides = [1, 1]} : vector<8x128xf32> to vector<8x32xf32>
    %201 = math.tanh %200 : vector<8x32xf32>
    %202 = arith.mulf %198, %166 : vector<8x32xf32>
    %203 = arith.mulf %197, %201 : vector<8x32xf32>
    %204 = arith.addf %202, %203 : vector<8x32xf32>
    %205 = math.tanh %204 : vector<8x32xf32>
    %206 = arith.mulf %199, %205 : vector<8x32xf32>
    %c3_95 = arith.constant 3 : index
    %c0_96 = arith.constant 0 : index
    %c0_97 = arith.constant 0 : index
    %207 = vector.load %arg13[%c3_95, %c0_96, %c0_97] : memref<8x8x128xf32, #tpu.memory_space<vmem>>, vector<1x8x128xf32>
    %208 = vector.shape_cast %207 : vector<1x8x128xf32> to vector<8x128xf32>
    %cst_98 = arith.constant dense<0.000000e+00> : vector<8x128xf32>
    %209 = tpu.matmul %187, %89, %cst_98 {dimension_numbers = #tpu.dot_dimension_numbers<[1], [0], [0], [1], [0, 0, 1, 1], [], []>} : vector<8x32xf32>, vector<32x128xf32>, vector<8x128xf32> -> vector<8x128xf32>
    %210 = arith.addf %208, %209 : vector<8x128xf32>
    %211 = arith.negf %210 : vector<8x128xf32>
    %212 = math.exp %211 : vector<8x128xf32>
    %cst_99 = arith.constant 1.000000e+00 : f32
    %213 = vector.broadcast %cst_99 : f32 to vector<8x128xf32>
    %214 = arith.addf %213, %212 : vector<8x128xf32>
    %215 = arith.divf %213, %214 : vector<8x128xf32>
    %216 = vector.extract_strided_slice %215 {offsets = [0, 0], sizes = [8, 32], strides = [1, 1]} : vector<8x128xf32> to vector<8x32xf32>
    %217 = vector.extract_strided_slice %215 {offsets = [0, 32], sizes = [8, 32], strides = [1, 1]} : vector<8x128xf32> to vector<8x32xf32>
    %218 = vector.extract_strided_slice %215 {offsets = [0, 96], sizes = [8, 32], strides = [1, 1]} : vector<8x128xf32> to vector<8x32xf32>
    %219 = vector.extract_strided_slice %210 {offsets = [0, 64], sizes = [8, 32], strides = [1, 1]} : vector<8x128xf32> to vector<8x32xf32>
    %220 = math.tanh %219 : vector<8x32xf32>
    %221 = arith.mulf %217, %185 : vector<8x32xf32>
    %222 = arith.mulf %216, %220 : vector<8x32xf32>
    %223 = arith.addf %221, %222 : vector<8x32xf32>
    %224 = math.tanh %223 : vector<8x32xf32>
    %225 = arith.mulf %218, %224 : vector<8x32xf32>
    %cst_100 = arith.constant dense<0.000000e+00> : vector<8x128xf32>
    %226 = tpu.matmul %225, %90, %cst_100 {dimension_numbers = #tpu.dot_dimension_numbers<[1], [0], [0], [1], [0, 0, 1, 1], [], []>} : vector<8x32xf32>, vector<32x128xf32>, vector<8x128xf32> -> vector<8x128xf32>
    %cst_101 = arith.constant dense<0.000000e+00> : vector<8x128xf32>
    %227 = tpu.matmul %206, %91, %cst_101 {dimension_numbers = #tpu.dot_dimension_numbers<[1], [0], [0], [1], [0, 0, 1, 1], [], []>} : vector<8x32xf32>, vector<32x128xf32>, vector<8x128xf32> -> vector<8x128xf32>
    %228 = arith.addf %226, %227 : vector<8x128xf32>
    %229 = arith.addf %228, %88 : vector<8x128xf32>
    %230 = arith.negf %229 : vector<8x128xf32>
    %231 = math.exp %230 : vector<8x128xf32>
    %cst_102 = arith.constant 1.000000e+00 : f32
    %232 = vector.broadcast %cst_102 : f32 to vector<8x128xf32>
    %233 = arith.addf %232, %231 : vector<8x128xf32>
    %234 = arith.divf %232, %233 : vector<8x128xf32>
    %235 = vector.extract_strided_slice %234 {offsets = [0, 0], sizes = [8, 32], strides = [1, 1]} : vector<8x128xf32> to vector<8x32xf32>
    %236 = vector.extract_strided_slice %234 {offsets = [0, 32], sizes = [8, 32], strides = [1, 1]} : vector<8x128xf32> to vector<8x32xf32>
    %237 = vector.extract_strided_slice %234 {offsets = [0, 96], sizes = [8, 32], strides = [1, 1]} : vector<8x128xf32> to vector<8x32xf32>
    %238 = vector.extract_strided_slice %229 {offsets = [0, 64], sizes = [8, 32], strides = [1, 1]} : vector<8x128xf32> to vector<8x32xf32>
    %239 = math.tanh %238 : vector<8x32xf32>
    %240 = arith.mulf %236, %204 : vector<8x32xf32>
    %241 = arith.mulf %235, %239 : vector<8x32xf32>
    %242 = arith.addf %240, %241 : vector<8x32xf32>
    %243 = math.tanh %242 : vector<8x32xf32>
    %244 = arith.mulf %237, %243 : vector<8x32xf32>
    %c4_103 = arith.constant 4 : index
    %c0_104 = arith.constant 0 : index
    %c0_105 = arith.constant 0 : index
    %245 = vector.load %arg13[%c4_103, %c0_104, %c0_105] : memref<8x8x128xf32, #tpu.memory_space<vmem>>, vector<1x8x128xf32>
    %246 = vector.shape_cast %245 : vector<1x8x128xf32> to vector<8x128xf32>
    %cst_106 = arith.constant dense<0.000000e+00> : vector<8x128xf32>
    %247 = tpu.matmul %225, %89, %cst_106 {dimension_numbers = #tpu.dot_dimension_numbers<[1], [0], [0], [1], [0, 0, 1, 1], [], []>} : vector<8x32xf32>, vector<32x128xf32>, vector<8x128xf32> -> vector<8x128xf32>
    %248 = arith.addf %246, %247 : vector<8x128xf32>
    %249 = arith.negf %248 : vector<8x128xf32>
    %250 = math.exp %249 : vector<8x128xf32>
    %cst_107 = arith.constant 1.000000e+00 : f32
    %251 = vector.broadcast %cst_107 : f32 to vector<8x128xf32>
    %252 = arith.addf %251, %250 : vector<8x128xf32>
    %253 = arith.divf %251, %252 : vector<8x128xf32>
    %254 = vector.extract_strided_slice %253 {offsets = [0, 0], sizes = [8, 32], strides = [1, 1]} : vector<8x128xf32> to vector<8x32xf32>
    %255 = vector.extract_strided_slice %253 {offsets = [0, 32], sizes = [8, 32], strides = [1, 1]} : vector<8x128xf32> to vector<8x32xf32>
    %256 = vector.extract_strided_slice %253 {offsets = [0, 96], sizes = [8, 32], strides = [1, 1]} : vector<8x128xf32> to vector<8x32xf32>
    %257 = vector.extract_strided_slice %248 {offsets = [0, 64], sizes = [8, 32], strides = [1, 1]} : vector<8x128xf32> to vector<8x32xf32>
    %258 = math.tanh %257 : vector<8x32xf32>
    %259 = arith.mulf %255, %223 : vector<8x32xf32>
    %260 = arith.mulf %254, %258 : vector<8x32xf32>
    %261 = arith.addf %259, %260 : vector<8x32xf32>
    %262 = math.tanh %261 : vector<8x32xf32>
    %263 = arith.mulf %256, %262 : vector<8x32xf32>
    %cst_108 = arith.constant dense<0.000000e+00> : vector<8x128xf32>
    %264 = tpu.matmul %263, %90, %cst_108 {dimension_numbers = #tpu.dot_dimension_numbers<[1], [0], [0], [1], [0, 0, 1, 1], [], []>} : vector<8x32xf32>, vector<32x128xf32>, vector<8x128xf32> -> vector<8x128xf32>
    %cst_109 = arith.constant dense<0.000000e+00> : vector<8x128xf32>
    %265 = tpu.matmul %244, %91, %cst_109 {dimension_numbers = #tpu.dot_dimension_numbers<[1], [0], [0], [1], [0, 0, 1, 1], [], []>} : vector<8x32xf32>, vector<32x128xf32>, vector<8x128xf32> -> vector<8x128xf32>
    %266 = arith.addf %264, %265 : vector<8x128xf32>
    %267 = arith.addf %266, %88 : vector<8x128xf32>
    %268 = arith.negf %267 : vector<8x128xf32>
    %269 = math.exp %268 : vector<8x128xf32>
    %cst_110 = arith.constant 1.000000e+00 : f32
    %270 = vector.broadcast %cst_110 : f32 to vector<8x128xf32>
    %271 = arith.addf %270, %269 : vector<8x128xf32>
    %272 = arith.divf %270, %271 : vector<8x128xf32>
    %273 = vector.extract_strided_slice %272 {offsets = [0, 0], sizes = [8, 32], strides = [1, 1]} : vector<8x128xf32> to vector<8x32xf32>
    %274 = vector.extract_strided_slice %272 {offsets = [0, 32], sizes = [8, 32], strides = [1, 1]} : vector<8x128xf32> to vector<8x32xf32>
    %275 = vector.extract_strided_slice %272 {offsets = [0, 96], sizes = [8, 32], strides = [1, 1]} : vector<8x128xf32> to vector<8x32xf32>
    %276 = vector.extract_strided_slice %267 {offsets = [0, 64], sizes = [8, 32], strides = [1, 1]} : vector<8x128xf32> to vector<8x32xf32>
    %277 = math.tanh %276 : vector<8x32xf32>
    %278 = arith.mulf %274, %242 : vector<8x32xf32>
    %279 = arith.mulf %273, %277 : vector<8x32xf32>
    %280 = arith.addf %278, %279 : vector<8x32xf32>
    %281 = math.tanh %280 : vector<8x32xf32>
    %282 = arith.mulf %275, %281 : vector<8x32xf32>
    %c5_111 = arith.constant 5 : index
    %c0_112 = arith.constant 0 : index
    %c0_113 = arith.constant 0 : index
    %283 = vector.load %arg13[%c5_111, %c0_112, %c0_113] : memref<8x8x128xf32, #tpu.memory_space<vmem>>, vector<1x8x128xf32>
    %284 = vector.shape_cast %283 : vector<1x8x128xf32> to vector<8x128xf32>
    %cst_114 = arith.constant dense<0.000000e+00> : vector<8x128xf32>
    %285 = tpu.matmul %263, %89, %cst_114 {dimension_numbers = #tpu.dot_dimension_numbers<[1], [0], [0], [1], [0, 0, 1, 1], [], []>} : vector<8x32xf32>, vector<32x128xf32>, vector<8x128xf32> -> vector<8x128xf32>
    %286 = arith.addf %284, %285 : vector<8x128xf32>
    %287 = arith.negf %286 : vector<8x128xf32>
    %288 = math.exp %287 : vector<8x128xf32>
    %cst_115 = arith.constant 1.000000e+00 : f32
    %289 = vector.broadcast %cst_115 : f32 to vector<8x128xf32>
    %290 = arith.addf %289, %288 : vector<8x128xf32>
    %291 = arith.divf %289, %290 : vector<8x128xf32>
    %292 = vector.extract_strided_slice %291 {offsets = [0, 0], sizes = [8, 32], strides = [1, 1]} : vector<8x128xf32> to vector<8x32xf32>
    %293 = vector.extract_strided_slice %291 {offsets = [0, 32], sizes = [8, 32], strides = [1, 1]} : vector<8x128xf32> to vector<8x32xf32>
    %294 = vector.extract_strided_slice %291 {offsets = [0, 96], sizes = [8, 32], strides = [1, 1]} : vector<8x128xf32> to vector<8x32xf32>
    %295 = vector.extract_strided_slice %286 {offsets = [0, 64], sizes = [8, 32], strides = [1, 1]} : vector<8x128xf32> to vector<8x32xf32>
    %296 = math.tanh %295 : vector<8x32xf32>
    %297 = arith.mulf %293, %261 : vector<8x32xf32>
    %298 = arith.mulf %292, %296 : vector<8x32xf32>
    %299 = arith.addf %297, %298 : vector<8x32xf32>
    %300 = math.tanh %299 : vector<8x32xf32>
    %301 = arith.mulf %294, %300 : vector<8x32xf32>
    %cst_116 = arith.constant dense<0.000000e+00> : vector<8x128xf32>
    %302 = tpu.matmul %301, %90, %cst_116 {dimension_numbers = #tpu.dot_dimension_numbers<[1], [0], [0], [1], [0, 0, 1, 1], [], []>} : vector<8x32xf32>, vector<32x128xf32>, vector<8x128xf32> -> vector<8x128xf32>
    %cst_117 = arith.constant dense<0.000000e+00> : vector<8x128xf32>
    %303 = tpu.matmul %282, %91, %cst_117 {dimension_numbers = #tpu.dot_dimension_numbers<[1], [0], [0], [1], [0, 0, 1, 1], [], []>} : vector<8x32xf32>, vector<32x128xf32>, vector<8x128xf32> -> vector<8x128xf32>
    %304 = arith.addf %302, %303 : vector<8x128xf32>
    %305 = arith.addf %304, %88 : vector<8x128xf32>
    %306 = arith.negf %305 : vector<8x128xf32>
    %307 = math.exp %306 : vector<8x128xf32>
    %cst_118 = arith.constant 1.000000e+00 : f32
    %308 = vector.broadcast %cst_118 : f32 to vector<8x128xf32>
    %309 = arith.addf %308, %307 : vector<8x128xf32>
    %310 = arith.divf %308, %309 : vector<8x128xf32>
    %311 = vector.extract_strided_slice %310 {offsets = [0, 0], sizes = [8, 32], strides = [1, 1]} : vector<8x128xf32> to vector<8x32xf32>
    %312 = vector.extract_strided_slice %310 {offsets = [0, 32], sizes = [8, 32], strides = [1, 1]} : vector<8x128xf32> to vector<8x32xf32>
    %313 = vector.extract_strided_slice %310 {offsets = [0, 96], sizes = [8, 32], strides = [1, 1]} : vector<8x128xf32> to vector<8x32xf32>
    %314 = vector.extract_strided_slice %305 {offsets = [0, 64], sizes = [8, 32], strides = [1, 1]} : vector<8x128xf32> to vector<8x32xf32>
    %315 = math.tanh %314 : vector<8x32xf32>
    %316 = arith.mulf %312, %280 : vector<8x32xf32>
    %317 = arith.mulf %311, %315 : vector<8x32xf32>
    %318 = arith.addf %316, %317 : vector<8x32xf32>
    %319 = math.tanh %318 : vector<8x32xf32>
    %320 = arith.mulf %313, %319 : vector<8x32xf32>
    %c6_119 = arith.constant 6 : index
    %c0_120 = arith.constant 0 : index
    %c0_121 = arith.constant 0 : index
    %321 = vector.load %arg13[%c6_119, %c0_120, %c0_121] : memref<8x8x128xf32, #tpu.memory_space<vmem>>, vector<1x8x128xf32>
    %322 = vector.shape_cast %321 : vector<1x8x128xf32> to vector<8x128xf32>
    %cst_122 = arith.constant dense<0.000000e+00> : vector<8x128xf32>
    %323 = tpu.matmul %301, %89, %cst_122 {dimension_numbers = #tpu.dot_dimension_numbers<[1], [0], [0], [1], [0, 0, 1, 1], [], []>} : vector<8x32xf32>, vector<32x128xf32>, vector<8x128xf32> -> vector<8x128xf32>
    %324 = arith.addf %322, %323 : vector<8x128xf32>
    %325 = arith.negf %324 : vector<8x128xf32>
    %326 = math.exp %325 : vector<8x128xf32>
    %cst_123 = arith.constant 1.000000e+00 : f32
    %327 = vector.broadcast %cst_123 : f32 to vector<8x128xf32>
    %328 = arith.addf %327, %326 : vector<8x128xf32>
    %329 = arith.divf %327, %328 : vector<8x128xf32>
    %330 = vector.extract_strided_slice %329 {offsets = [0, 0], sizes = [8, 32], strides = [1, 1]} : vector<8x128xf32> to vector<8x32xf32>
    %331 = vector.extract_strided_slice %329 {offsets = [0, 32], sizes = [8, 32], strides = [1, 1]} : vector<8x128xf32> to vector<8x32xf32>
    %332 = vector.extract_strided_slice %329 {offsets = [0, 96], sizes = [8, 32], strides = [1, 1]} : vector<8x128xf32> to vector<8x32xf32>
    %333 = vector.extract_strided_slice %324 {offsets = [0, 64], sizes = [8, 32], strides = [1, 1]} : vector<8x128xf32> to vector<8x32xf32>
    %334 = math.tanh %333 : vector<8x32xf32>
    %335 = arith.mulf %331, %299 : vector<8x32xf32>
    %336 = arith.mulf %330, %334 : vector<8x32xf32>
    %337 = arith.addf %335, %336 : vector<8x32xf32>
    %338 = math.tanh %337 : vector<8x32xf32>
    %339 = arith.mulf %332, %338 : vector<8x32xf32>
    %cst_124 = arith.constant dense<0.000000e+00> : vector<8x128xf32>
    %340 = tpu.matmul %339, %90, %cst_124 {dimension_numbers = #tpu.dot_dimension_numbers<[1], [0], [0], [1], [0, 0, 1, 1], [], []>} : vector<8x32xf32>, vector<32x128xf32>, vector<8x128xf32> -> vector<8x128xf32>
    %cst_125 = arith.constant dense<0.000000e+00> : vector<8x128xf32>
    %341 = tpu.matmul %320, %91, %cst_125 {dimension_numbers = #tpu.dot_dimension_numbers<[1], [0], [0], [1], [0, 0, 1, 1], [], []>} : vector<8x32xf32>, vector<32x128xf32>, vector<8x128xf32> -> vector<8x128xf32>
    %342 = arith.addf %340, %341 : vector<8x128xf32>
    %343 = arith.addf %342, %88 : vector<8x128xf32>
    %344 = arith.negf %343 : vector<8x128xf32>
    %345 = math.exp %344 : vector<8x128xf32>
    %cst_126 = arith.constant 1.000000e+00 : f32
    %346 = vector.broadcast %cst_126 : f32 to vector<8x128xf32>
    %347 = arith.addf %346, %345 : vector<8x128xf32>
    %348 = arith.divf %346, %347 : vector<8x128xf32>
    %349 = vector.extract_strided_slice %348 {offsets = [0, 0], sizes = [8, 32], strides = [1, 1]} : vector<8x128xf32> to vector<8x32xf32>
    %350 = vector.extract_strided_slice %348 {offsets = [0, 32], sizes = [8, 32], strides = [1, 1]} : vector<8x128xf32> to vector<8x32xf32>
    %351 = vector.extract_strided_slice %348 {offsets = [0, 96], sizes = [8, 32], strides = [1, 1]} : vector<8x128xf32> to vector<8x32xf32>
    %352 = vector.extract_strided_slice %343 {offsets = [0, 64], sizes = [8, 32], strides = [1, 1]} : vector<8x128xf32> to vector<8x32xf32>
    %353 = math.tanh %352 : vector<8x32xf32>
    %354 = arith.mulf %350, %318 : vector<8x32xf32>
    %355 = arith.mulf %349, %353 : vector<8x32xf32>
    %356 = arith.addf %354, %355 : vector<8x32xf32>
    %357 = math.tanh %356 : vector<8x32xf32>
    %358 = arith.mulf %351, %357 : vector<8x32xf32>
    %c7_127 = arith.constant 7 : index
    %c0_128 = arith.constant 0 : index
    %c0_129 = arith.constant 0 : index
    %359 = vector.load %arg13[%c7_127, %c0_128, %c0_129] : memref<8x8x128xf32, #tpu.memory_space<vmem>>, vector<1x8x128xf32>
    %360 = vector.shape_cast %359 : vector<1x8x128xf32> to vector<8x128xf32>
    %cst_130 = arith.constant dense<0.000000e+00> : vector<8x128xf32>
    %361 = tpu.matmul %339, %89, %cst_130 {dimension_numbers = #tpu.dot_dimension_numbers<[1], [0], [0], [1], [0, 0, 1, 1], [], []>} : vector<8x32xf32>, vector<32x128xf32>, vector<8x128xf32> -> vector<8x128xf32>
    %362 = arith.addf %360, %361 : vector<8x128xf32>
    %363 = arith.negf %362 : vector<8x128xf32>
    %364 = math.exp %363 : vector<8x128xf32>
    %cst_131 = arith.constant 1.000000e+00 : f32
    %365 = vector.broadcast %cst_131 : f32 to vector<8x128xf32>
    %366 = arith.addf %365, %364 : vector<8x128xf32>
    %367 = arith.divf %365, %366 : vector<8x128xf32>
    %368 = vector.extract_strided_slice %367 {offsets = [0, 0], sizes = [8, 32], strides = [1, 1]} : vector<8x128xf32> to vector<8x32xf32>
    %369 = vector.extract_strided_slice %367 {offsets = [0, 32], sizes = [8, 32], strides = [1, 1]} : vector<8x128xf32> to vector<8x32xf32>
    %370 = vector.extract_strided_slice %367 {offsets = [0, 96], sizes = [8, 32], strides = [1, 1]} : vector<8x128xf32> to vector<8x32xf32>
    %371 = vector.extract_strided_slice %362 {offsets = [0, 64], sizes = [8, 32], strides = [1, 1]} : vector<8x128xf32> to vector<8x32xf32>
    %372 = math.tanh %371 : vector<8x32xf32>
    %373 = arith.mulf %369, %337 : vector<8x32xf32>
    %374 = arith.mulf %368, %372 : vector<8x32xf32>
    %375 = arith.addf %373, %374 : vector<8x32xf32>
    %376 = math.tanh %375 : vector<8x32xf32>
    %377 = arith.mulf %370, %376 : vector<8x32xf32>
    %cst_132 = arith.constant dense<0.000000e+00> : vector<8x128xf32>
    %378 = tpu.matmul %377, %90, %cst_132 {dimension_numbers = #tpu.dot_dimension_numbers<[1], [0], [0], [1], [0, 0, 1, 1], [], []>} : vector<8x32xf32>, vector<32x128xf32>, vector<8x128xf32> -> vector<8x128xf32>
    %cst_133 = arith.constant dense<0.000000e+00> : vector<8x128xf32>
    %379 = tpu.matmul %358, %91, %cst_133 {dimension_numbers = #tpu.dot_dimension_numbers<[1], [0], [0], [1], [0, 0, 1, 1], [], []>} : vector<8x32xf32>, vector<32x128xf32>, vector<8x128xf32> -> vector<8x128xf32>
    %380 = arith.addf %378, %379 : vector<8x128xf32>
    %381 = arith.addf %380, %88 : vector<8x128xf32>
    %382 = arith.negf %381 : vector<8x128xf32>
    %383 = math.exp %382 : vector<8x128xf32>
    %cst_134 = arith.constant 1.000000e+00 : f32
    %384 = vector.broadcast %cst_134 : f32 to vector<8x128xf32>
    %385 = arith.addf %384, %383 : vector<8x128xf32>
    %386 = arith.divf %384, %385 : vector<8x128xf32>
    %387 = vector.extract_strided_slice %386 {offsets = [0, 0], sizes = [8, 32], strides = [1, 1]} : vector<8x128xf32> to vector<8x32xf32>
    %388 = vector.extract_strided_slice %386 {offsets = [0, 32], sizes = [8, 32], strides = [1, 1]} : vector<8x128xf32> to vector<8x32xf32>
    %389 = vector.extract_strided_slice %386 {offsets = [0, 96], sizes = [8, 32], strides = [1, 1]} : vector<8x128xf32> to vector<8x32xf32>
    %390 = vector.extract_strided_slice %381 {offsets = [0, 64], sizes = [8, 32], strides = [1, 1]} : vector<8x128xf32> to vector<8x32xf32>
    %391 = math.tanh %390 : vector<8x32xf32>
    %392 = arith.mulf %388, %356 : vector<8x32xf32>
    %393 = arith.mulf %387, %391 : vector<8x32xf32>
    %394 = arith.addf %392, %393 : vector<8x32xf32>
    %395 = math.tanh %394 : vector<8x32xf32>
    %396 = arith.mulf %389, %395 : vector<8x32xf32>
    %c0_135 = arith.constant 0 : index
    %c0_136 = arith.constant 0 : index
    %397 = vector.load %arg10[%c0_135, %c0_136] : memref<32x7xf32, #tpu.memory_space<vmem>>, vector<32x7xf32>
    %cst_137 = arith.constant dense<0.000000e+00> : vector<8x7xf32>
    %398 = tpu.matmul %396, %397, %cst_137 {dimension_numbers = #tpu.dot_dimension_numbers<[1], [0], [0], [1], [0, 0, 1, 1], [], []>} : vector<8x32xf32>, vector<32x7xf32>, vector<8x7xf32> -> vector<8x7xf32>
    %c0_138 = arith.constant 0 : index
    %c0_139 = arith.constant 0 : index
    %399 = vector.load %arg11[%c0_138, %c0_139] : memref<1x7xf32, #tpu.memory_space<vmem>>, vector<1x7xf32>
    %400 = vector.broadcast %399 : vector<1x7xf32> to vector<8x7xf32>
    %401 = arith.addf %398, %400 : vector<8x7xf32>
    %c0_140 = arith.constant 0 : index
    %c0_141 = arith.constant 0 : index
    %402 = vector.load %arg12[%c0_140, %c0_141] : memref<8x7xf32, #tpu.memory_space<vmem>>, vector<8x7xf32>
    tpu.vector_store %arg12[%c0_140, %c0_141], %401 {strides = array<i32>} : memref<8x7xf32, #tpu.memory_space<vmem>>, vector<8x7xf32>,
    return
  }
  func.func @transform_0(%arg0: i32) -> (i32, i32, i32) {
    %c0_i32 = arith.constant 0 : i32
    %c0_i32_0 = arith.constant 0 : i32
    %c0_i32_1 = arith.constant 0 : i32
    return %c0_i32, %arg0, %c0_i32_0 : i32, i32, i32
  }
  func.func @transform_1(%arg0: i32) -> (i32, i32) {
    %c0_i32 = arith.constant 0 : i32
    %c0_i32_0 = arith.constant 0 : i32
    return %arg0, %c0_i32 : i32, i32
  }
  func.func @transform_2(%arg0: i32) -> (i32, i32) {
    %c0_i32 = arith.constant 0 : i32
    %c0_i32_0 = arith.constant 0 : i32
    %c0_i32_1 = arith.constant 0 : i32
    return %c0_i32, %c0_i32_0 : i32, i32
  }
  func.func @transform_3(%arg0: i32) -> (i32, i32) {
    %c0_i32 = arith.constant 0 : i32
    %c0_i32_0 = arith.constant 0 : i32
    %c0_i32_1 = arith.constant 0 : i32
    return %c0_i32, %c0_i32_0 : i32, i32
  }
  func.func @transform_4(%arg0: i32) -> (i32, i32) {
    %c0_i32 = arith.constant 0 : i32
    %c0_i32_0 = arith.constant 0 : i32
    %c0_i32_1 = arith.constant 0 : i32
    return %c0_i32, %c0_i32_0 : i32, i32
  }
  func.func @transform_5(%arg0: i32) -> (i32, i32) {
    %c0_i32 = arith.constant 0 : i32
    %c0_i32_0 = arith.constant 0 : i32
    %c0_i32_1 = arith.constant 0 : i32
    return %c0_i32, %c0_i32_0 : i32, i32
  }
  func.func @transform_6(%arg0: i32) -> (i32, i32) {
    %c0_i32 = arith.constant 0 : i32
    %c0_i32_0 = arith.constant 0 : i32
    %c0_i32_1 = arith.constant 0 : i32
    return %c0_i32, %c0_i32_0 : i32, i32
  }
  func.func @transform_7(%arg0: i32) -> (i32, i32) {
    %c0_i32 = arith.constant 0 : i32
    %c0_i32_0 = arith.constant 0 : i32
    %c0_i32_1 = arith.constant 0 : i32
    return %c0_i32, %c0_i32_0 : i32, i32
  }
  func.func @transform_8(%arg0: i32) -> (i32, i32) {
    %c0_i32 = arith.constant 0 : i32
    %c0_i32_0 = arith.constant 0 : i32
    %c0_i32_1 = arith.constant 0 : i32
    return %c0_i32, %c0_i32_0 : i32, i32
  }
  func.func @transform_9(%arg0: i32) -> (i32, i32) {
    %c0_i32 = arith.constant 0 : i32
    %c0_i32_0 = arith.constant 0 : i32
    %c0_i32_1 = arith.constant 0 : i32
    return %c0_i32, %c0_i32_0 : i32, i32
  }
  func.func @transform_10(%arg0: i32) -> (i32, i32) {
    %c0_i32 = arith.constant 0 : i32
    %c0_i32_0 = arith.constant 0 : i32
    %c0_i32_1 = arith.constant 0 : i32
    return %c0_i32, %c0_i32_0 : i32, i32
  }
  func.func @transform_11(%arg0: i32) -> (i32, i32) {
    %c0_i32 = arith.constant 0 : i32
    %c0_i32_0 = arith.constant 0 : i32
    return %arg0, %c0_i32 : i32, i32
  }
}

</mosaic_0001>

<bundles_post_ra>
// kernel: tpu_custom_call.1
= control target key start
LH: loop header
LB: loop body
LE: loop exit
PB: predicated region body
PF: predicated region fallthrough
CT: control target
= control target key end

     0   :  { %16 = vsyncpa [#allocation4], 0  ;;  %s3883_s0 = inlined_call_operand.vmem [shape: f32[8,8,1], index: 0, kind: input, shape index: {}]   ;;  %s3884_s1 = inlined_call_operand.hbm [shape: f32[8,10], index: 1, kind: input, shape index: {}]   ;;  %s3885_s2 = inlined_call_operand.vmem [shape: f32[1,128], index: 2, kind: input, shape index: {}]   ;;  %s3886_s3 = inlined_call_operand.vmem [shape: f32[10,128], index: 3, kind: input, shape index: {}]   ;;  %s3887_s4 = inlined_call_operand.vmem [shape: f32[1,128], index: 4, kind: input, shape index: {}]   ;;  %s3888_s5 = inlined_call_operand.vmem [shape: f32[32,128], index: 5, kind: input, shape index: {}]   ;;  %s3889_s6 = inlined_call_operand.vmem [shape: f32[32,128], index: 6, kind: input, shape index: {}]   ;;  %s3890_s7 = inlined_call_operand.vmem [shape: f32[32,128], index: 7, kind: input, shape index: {}]   ;;  %s3891_s8 = inlined_call_operand.vmem [shape: f32[1,128], index: 8, kind: input, shape index: {}]   ;;  %s3892_s9 = inlined_call_operand.vmem [shape: f32[32,7], index: 9, kind: input, shape index: {}]   ;;  %s3893_s10 = inlined_call_operand.vmem [shape: f32[1,7], index: 10, kind: input, shape index: {}]   ;;  %s3894_s11 = inlined_call_operand.hbm [shape: f32[8,7], index: 11, kind: output, shape index: {}]  }
   0x1   :  { %17 = vsyncpa [#allocation5], 0  ;;  %s3234_s17 = smov [#allocation3]  }
   0x2   :  { %s26_s18 = sshll.u32 %s3234_s17, 4  ;;  %s27_s18 = int_to_ptr.vmem [resolvable:$true] %s26_s18 }
   0x3   :  { %s3198_s19 = scalar_lea.vmem %s27_s18, 128  ;;  %p3203_p1 = scmp.lt.s32.totalorder %s27_s18, %s27_s18 }
   0x4   :  { %p3199_p0 = scmp.ne.s32.totalorder %s27_s18, %s3198_s19  ;;  %p3204_p2 = scmp.lt.s32.totalorder %s3198_s19, %s3198_s19 }
   0x6   :  { %p3205_p3 = por %p3204_p2, %p3203_p1 }
   0x8   :  { %p3206_p4 = pnand %p3205_p3, %p3199_p0 }
   0xa   :  { %3209 = shalt.err (!%p3206_p4)
}
   0xb   :  { %29 = dma.hbm_to_vmem [thread:$0]  %s3884_s1, 128, %s27_s18, [#allocation4]  }
   0xc   :  { %3230 = dma.done.wait [#allocation4], 128  }
   0xd   :  { %3231 = vsyncadd [#allocation4], 4294967168  ;;  %v3235_v0 = vmov 0.0   ;;  %vm3236_vm0 = vmmov 0   ;;  %v3237_v1 = vmov 0   ;;  %vm65_vm1 = vcmask 1041408  }
   0xe   :  { %2757 = vmatprep.subr.mxu0 %v3235_v0  ;;  %2764 = vmatprep.subr.mxu1 %v3235_v0  ;;  %v53_v2 = vld [vmem:[%s3886_s3 + $0x8] sm:$0x3]  ;;  %v3316_v3 = vld [vmem:[%s3888_s5 + $0x18] sm:$0xff]  ;;  %v52_v4 = vld [vmem:[%s3886_s3] sm:$0xff]  ;;  %vm61_vm2 = vcmask 80896   ;;  %s3238_s19 = smov 64  }
   0xf   :  { %2761 = vmatprep.mubr.msk.f32.mxu0 %vm3236_vm0, %v3235_v0  ;;  %2772 = vmatprep.mubr.msk.f32.mxu1 %vm3236_vm0, %v3235_v0  ;;  %v3325_v5 = vld [vmem:[%s3888_s5 + $0x10] sm:$0xff]  ;;  %v51_v6 = vld [vmem:[#allocation3] sm:$0xff]  ;;  %v3332_v7 = vld [vmem:[%s3888_s5 + $0x8] sm:$0xff]  ;;  %vm301_vm3 = vcmask 261120   ;;  %s3240_s23 = smov [#allocation6]   ;;  %vm2553_vm4 = vcmask 56320  }
  0x10   :  { %3046 = vset.pattern.permute.xlu0 %v3237_v1  ;;  %3047 = vset.pattern.permute.xlu1 %v3237_v1  ;;  %v139_v8 = vld [vmem:[%s3883_s0] sm:$0xff]  ;;  %v3375_v32 = vld [vmem:[%s3890_s7 + $0x18] sm:$0xff]  ;;  %v3380_v33 = vld [vmem:[%s3890_s7 + $0x10] sm:$0xff] }
  0x11   :  { %2758 = vmatpush3.msk.msra.mxu0 %vm65_vm1, %v53_v2  ;;  %2765 = vmatpush3.msra.mxu1 %v3316_v3  ;;  %v3342_v9 = vld [vmem:[%s3888_s5] sm:$0xff]  ;;  %v2574_v34 = vld [vmem:[%s3883_s0 + $0x8] sm:$0xff]  ;;  %v3389_v35 = vld [vmem:[%s3889_s6 + $0x18] sm:$0xff] }
  0x12   :  { %2759 = vmatprep.subr.mxu0 %v3235_v0  ;;  %2766 = vmatprep.subr.mxu1 %v3235_v0  ;;  %v3357_v10 = vld [vmem:[%s3885_s2] ss:$0 sm:$0xff]  ;;  %v3395_v36 = vld [vmem:[%s3890_s7 + $0x8] sm:$0xff]  ;;  %v3401_v37 = vld [vmem:[%s3889_s6 + $0x10] sm:$0xff] }
  0x13   :  { %2760 = vmatpush3.msra.mxu0 %v52_v4  ;;  %2767 = vmatpush3.msra.mxu1 %v3325_v5  ;;  %v2570_v12 = vld [vmem:[%s3887_s4] ss:$0 sm:$0xff]  ;;  %s3239_s4 = smov 32   ;;  %v3414_v39 = vld [vmem:[%s3889_s6 + $0x8] sm:$0xff] }
  0x14   :  { %2762 = vmatmul.mubr.msk.f32.vlgmr.msra.gmra.mxu0 %vm61_vm2, %v51_v6  ;;  %2768 = vmatprep.subr.mxu1 %v3235_v0  ;;  %v3409_v38 = vld [vmem:[%s3890_s7] sm:$0xff] }
  0x15   :  { %2769 = vmatpush3.msra.mxu1 %v3332_v7  ;;  %143 = vperm.xlu0 %3046, %v139_v8   ;;  %v3425_v40 = vld [vmem:[%s3889_s6] sm:$0xff] }
  0x16   :  { %2770 = vmatprep.subr.mxu1 %v3235_v0  ;;  %2775 = vmatprep.subr.mxu0 %v3235_v0  ;;  %v3470_v49 = vld [vmem:[%s3891_s8] ss:$0 sm:$0xff] }
  0x17   :  { %2771 = vmatpush3.msra.mxu1 %v3342_v9  ;;  %2783 = vmatprep.mubr.msk.f32.mxu0 %vm3236_vm0, %v3235_v0 }
  0x18   :  { %2773 = vmatmul.mubr.f32.vlgmr.msra.gmra.mxu1 %v3235_v0  ;;  %2786 = vmatprep.subr.mxu1 %v3235_v0 }
  0x19   :  { %2794 = vmatprep.mubr.msk.f32.mxu1 %vm3236_vm0, %v3235_v0  ;;  %2776 = vmatpush3.msra.mxu0 %v3375_v32 }
  0x1a   :  { %2777 = vmatprep.subr.mxu0 %v3235_v0  ;;  %2787 = vmatpush3.msra.mxu1 %v3389_v35 }
  0x1b   :  { %2778 = vmatpush3.msra.mxu0 %v3380_v33  ;;  %2788 = vmatprep.subr.mxu1 %v3235_v0 }
  0x1c   :  { %2779 = vmatprep.subr.mxu0 %v3235_v0  ;;  %2789 = vmatpush3.msra.mxu1 %v3401_v37 }
  0x1d   :  { %2780 = vmatpush3.msra.mxu0 %v3395_v36  ;;  %2790 = vmatprep.subr.mxu1 %v3235_v0 }
  0x1e   :  { %2781 = vmatprep.subr.mxu0 %v3235_v0  ;;  %2791 = vmatpush3.msra.mxu1 %v3414_v39 }
  0x1f   :  { %2782 = vmatpush3.msra.mxu0 %v3409_v38  ;;  %2792 = vmatprep.subr.mxu1 %v3235_v0 }
  0x20   :  { %2797 = vmatprep.subr.mxu0 %v3235_v0  ;;  %2784 = vmatmul.mubr.f32.vlgmr.msra.gmra.mxu0 %v3235_v0 }
  0x21   :  { %2798 = vmatpush3.msra.mxu0 %v3316_v3  ;;  %2793 = vmatpush3.msra.mxu1 %v3425_v40 }
  0x22   :  { %2799 = vmatprep.subr.mxu0 %v3235_v0  ;;  %2805 = vmatprep.mubr.msk.f32.mxu0 %vm3236_vm0, %v3235_v0 }
  0x23   :  { %2800 = vmatpush3.msra.mxu0 %v3325_v5  ;;  %2808 = vmatprep.subr.mxu1 %v3235_v0 }
  0x24   :  { %2801 = vmatprep.subr.mxu0 %v3235_v0 }
  0x25   :  { %2802 = vmatpush3.msra.mxu0 %v3332_v7 }
  0x26   :  { %2803 = vmatprep.subr.mxu0 %v3235_v0 }
  0x27   :  { %2804 = vmatpush3.msra.mxu0 %v3342_v9 }
  0x28   :  { %2819 = vmatprep.subr.mxu0 %v3235_v0 }
  0x90   :  { %v144_v11 = vpop.permute.xlu0 %143 }
  0x91   :  { %v152_v13 = vmul.f32 %v3357_v10, %v144_v11 }
  0xd4   :  { %v135_v14 = vpop.f32.mrf.mxu0 }
  0xd5   :  { %v3363_v15 = vadd.f32 %v2570_v12, %v135_v14 }
  0xd6   :  { %v2763_v16 = vpop.f32.mrf.mxu0 }
  0xd7   :  { %v153_v17 = vadd.f32 %v152_v13, %v3363_v15 }
  0xd8   :  { %v371_v18 = vpop.f32.mrf.mxu1 }
  0xd9   :  { %v375_v19 = vadd.f32 %v371_v18, %v153_v17 }
  0xda   :  { %v2774_v20 = vpop.f32.mrf.mxu1 }
  0xdb   :  { %3048 = vtanh.f32 %v375_v19  ;;  %v2589_v22 = vmul.f32 -1.442695, %v375_v19 }
  0xdd   :  { %3050 = vpow2.f32 %v2589_v22 }
  0xe0   :  { %v466_v43 = vpop.f32.mrf.mxu0 }
  0xe2   :  { %v2785_v44 = vpop.f32.mrf.mxu0 }
  0xe8   :  { %v3049_v21 = vpop.eup %3048 }
  0xe9   :  { %385 = vrot.lane.b32.xlu0 %v3049_v21, %s3238_s19 }
  0xea   :  { %v3051_v23 = vpop.eup %3050 }
  0xeb   :  { %v379_v24 = vadd.f32 1.0, %v3051_v23 }
  0xed   :  { %3052 = vrcp.f32 %v379_v24 }
  0xfa   :  { %v3053_v25 = vpop.eup %3052 }
  0xfb   :  { %v383_v28 = vmul.f32 0.0, %v3053_v25 }
 0x15b   :  { %v386_v26 = vpop.permute.xlu0 %385 }
 0x15c   :  { %v388_v27 = vmul.f32 %v3053_v25, %v386_v26  ;;  %v2576_v26 = vld [vmem:[%s3883_s0 + $0x10] sm:$0xff] }
 0x15e   :  { %390 = vrot.lane.b32.xlu1 %v388_v27, %s3239_s4 }
 0x1d0   :  { %v391_v29 = vpop.permute.xlu1 %390 }
 0x1d1   :  { %v3368_v30 = vadd.f32 %v391_v29, %v383_v28 }
 0x1d3   :  { %3054 = vtanh.f32 %v3368_v30 }
 0x1e0   :  { %v3055_v31 = vpop.eup %3054 }
 0x1e1   :  { %396 = vrot.lane.b32.xlu1 %v3055_v31, %s3238_s19 }
 0x1e5   :  { %160 = vperm.xlu1 %3047, %v2574_v34  }
 0x253   :  { %v397_v41 = vpop.permute.xlu1 %396 }
 0x254   :  { %v399_v42 = vmul.f32 %v3053_v25, %v397_v41 }
 0x256   :  { %471 = vrot.lane.b32.xlu0 %v399_v42, %s3239_s4 }
 0x260   :  { %v161_v46 = vpop.permute.xlu1 %160 }
 0x261   :  { %v169_v47 = vmul.f32 %v3357_v10, %v161_v46 }
 0x263   :  { %v170_v48 = vadd.f32 %v169_v47, %v3363_v15 }
 0x2c8   :  { %v472_v45 = vpop.permute.xlu0 %471 }
 0x2c9   :  { %2795 = vmatmul.mubr.msk.f32.vlgmr.msra.gmra.mxu1 %vm301_vm3, %v472_v45  ;;  %2806 = vmatmul.mubr.msk.f32.vlgmr.msra.gmra.mxu0 %vm301_vm3, %v472_v45 }
 0x2ca   :  { %2820 = vmatpush3.msra.mxu0 %v3389_v35  ;;  %2809 = vmatpush3.msra.mxu1 %v3375_v32 }
 0x2cb   :  { %2821 = vmatprep.subr.mxu0 %v3235_v0  ;;  %2810 = vmatprep.subr.mxu1 %v3235_v0 }
 0x2cc   :  { %2822 = vmatpush3.msra.mxu0 %v3401_v37  ;;  %2811 = vmatpush3.msra.mxu1 %v3380_v33 }
 0x2cd   :  { %2823 = vmatprep.subr.mxu0 %v3235_v0  ;;  %2812 = vmatprep.subr.mxu1 %v3235_v0 }
 0x2ce   :  { %2824 = vmatpush3.msra.mxu0 %v3414_v39  ;;  %2813 = vmatpush3.msra.mxu1 %v3395_v36 }
 0x2cf   :  { %2825 = vmatprep.subr.mxu0 %v3235_v0  ;;  %2814 = vmatprep.subr.mxu1 %v3235_v0 }
 0x2d0   :  { %2826 = vmatpush3.msra.mxu0 %v3425_v40  ;;  %2827 = vmatprep.mubr.msk.f32.mxu0 %vm3236_vm0, %v3235_v0 }
 0x2d1   :  { %2815 = vmatpush3.msra.mxu1 %v3409_v38  ;;  %2816 = vmatprep.mubr.msk.f32.mxu1 %vm3236_vm0, %v3235_v0 }
 0x2d2   :  { %2830 = vmatprep.subr.mxu1 %v3235_v0  ;;  %2841 = vmatprep.subr.mxu0 %v3235_v0 }
 0x389   :  { %v541_v50 = vpop.f32.mrf.mxu1  ;;  %v637_v51 = vpop.f32.mrf.mxu0 }
 0x38a   :  { %v542_v52 = vadd.f32 %v541_v50, %v466_v43  ;;  %v641_v53 = vadd.f32 %v637_v51, %v170_v48 }
 0x38b   :  { %v2796_v54 = vpop.f32.mrf.mxu1  ;;  %v2807_v55 = vpop.f32.mrf.mxu0 }
 0x38c   :  { %v545_v56 = vadd.f32 %v3470_v49, %v542_v52  ;;  %3056 = vtanh.f32 %v641_v53  ;;  %v2593_v59 = vmul.f32 -1.442695, %v641_v53 }
 0x38e   :  { %3058 = vtanh.f32 %v545_v56  ;;  %v2591_v60 = vmul.f32 -1.442695, %v545_v56 }
 0x38f   :  { %3060 = vpow2.f32 %v2593_v59 }
 0x390   :  { %3062 = vpow2.f32 %v2591_v60 }
 0x399   :  { %v3057_v57 = vpop.eup %3056 }
 0x39a   :  { %651 = vrot.lane.b32.xlu1 %v3057_v57, %s3238_s19 }
 0x39b   :  { %v3059_v58 = vpop.eup %3058 }
 0x39c   :  { %555 = vrot.lane.b32.xlu0 %v3059_v58, %s3238_s19  ;;  %v3061_v61 = vpop.eup %3060 }
 0x39d   :  { %v3063_v62 = vpop.eup %3062  ;;  %v645_v63 = vadd.f32 1.0, %v3061_v61 }
 0x39e   :  { %v549_v1 = vadd.f32 1.0, %v3063_v62 }
 0x39f   :  { %3064 = vrcp.f32 %v645_v63 }
 0x3a0   :  { %3066 = vrcp.f32 %v549_v1 }
 0x3ac   :  { %v3065_v2 = vpop.eup %3064 }
 0x3ad   :  { %v3067_v8 = vpop.eup %3066  ;;  %v649_v13 = vmul.f32 %v3065_v2, %v3368_v30 }
 0x3ae   :  { %v553_v17 = vmul.f32 0.0, %v3067_v8 }
 0x40c   :  { %v652_v4 = vpop.permute.xlu1 %651 }
 0x40d   :  { %v654_v6 = vmul.f32 %v3065_v2, %v652_v4 }
 0x40e   :  { %v556_v11 = vpop.permute.xlu0 %555 }
 0x40f   :  { %v558_v12 = vmul.f32 %v3067_v8, %v556_v11  ;;  %656 = vrot.lane.b32.xlu1 %v654_v6, %s3239_s4 }
 0x411   :  { %560 = vrot.lane.b32.xlu0 %v558_v12, %s3239_s4 }
 0x481   :  { %v657_v14 = vpop.permute.xlu1 %656 }
 0x482   :  { %v3478_v16 = vadd.f32 %v657_v14, %v649_v13 }
 0x483   :  { %v561_v18 = vpop.permute.xlu0 %560 }
 0x484   :  { %3068 = vtanh.f32 %v3478_v16  ;;  %v3481_v19 = vadd.f32 %v561_v18, %v553_v17  ;;  %v2578_v18 = vld [vmem:[%s3883_s0 + $0x18] sm:$0xff] }
 0x486   :  { %3070 = vtanh.f32 %v3481_v19 }
 0x491   :  { %v3069_v20 = vpop.eup %3068 }
 0x492   :  { %662 = vrot.lane.b32.xlu1 %v3069_v20, %s3238_s19 }
 0x493   :  { %v3071_v21 = vpop.eup %3070 }
 0x494   :  { %566 = vrot.lane.b32.xlu0 %v3071_v21, %s3238_s19 }
 0x504   :  { %v663_v22 = vpop.permute.xlu1 %662 }
 0x505   :  { %v665_v23 = vmul.f32 %v3065_v2, %v663_v22 }
 0x506   :  { %v567_v24 = vpop.permute.xlu0 %566 }
 0x507   :  { %v569_v25 = vmul.f32 %v3067_v8, %v567_v24  ;;  %742 = vrot.lane.b32.xlu1 %v665_v23, %s3239_s4 }
 0x509   :  { %667 = vrot.lane.b32.xlu0 %v569_v25, %s3239_s4 }
 0x50d   :  { %178 = vperm.xlu0 %3046, %v2576_v26  }
 0x579   :  { %v743_v27 = vpop.permute.xlu1 %742 }
 0x57a   :  { %2828 = vmatmul.mubr.msk.f32.vlgmr.msra.gmra.mxu0 %vm301_vm3, %v743_v27 }
 0x57b   :  { %v668_v28 = vpop.permute.xlu0 %667  ;;  %2842 = vmatpush3.msra.mxu0 %v3375_v32  ;;  %2849 = vmatprep.mubr.msk.f32.mxu0 %vm3236_vm0, %v3235_v0 }
 0x57c   :  { %2817 = vmatmul.mubr.msk.f32.vlgmr.msra.gmra.mxu1 %vm301_vm3, %v668_v28  ;;  %2843 = vmatprep.subr.mxu0 %v3235_v0 }
 0x57d   :  { %2831 = vmatpush3.msra.mxu1 %v3316_v3  ;;  %2838 = vmatprep.mubr.msk.f32.mxu1 %vm3236_vm0, %v3235_v0 }
 0x57e   :  { %2832 = vmatprep.subr.mxu1 %v3235_v0  ;;  %2844 = vmatpush3.msra.mxu0 %v3380_v33 }
 0x57f   :  { %2833 = vmatpush3.msra.mxu1 %v3325_v5  ;;  %2845 = vmatprep.subr.mxu0 %v3235_v0 }
 0x580   :  { %2834 = vmatprep.subr.mxu1 %v3235_v0  ;;  %2846 = vmatpush3.msra.mxu0 %v3395_v36 }
 0x581   :  { %2835 = vmatpush3.msra.mxu1 %v3332_v7  ;;  %2847 = vmatprep.subr.mxu0 %v3235_v0 }
 0x582   :  { %2836 = vmatprep.subr.mxu1 %v3235_v0  ;;  %2848 = vmatpush3.msra.mxu0 %v3409_v38 }
 0x583   :  { %2837 = vmatpush3.msra.mxu1 %v3342_v9  ;;  %2863 = vmatprep.subr.mxu0 %v3235_v0 }
 0x584   :  { %2839 = vmatmul.mubr.msk.f32.vlgmr.msra.gmra.mxu1 %vm301_vm3, %v743_v27  ;;  %2852 = vmatprep.subr.mxu1 %v3235_v0 }
 0x585   :  { %2853 = vmatpush3.msra.mxu1 %v3389_v35  ;;  %2860 = vmatprep.mubr.msk.f32.mxu1 %vm3236_vm0, %v3235_v0 }
 0x586   :  { %2854 = vmatprep.subr.mxu1 %v3235_v0 }
 0x587   :  { %2855 = vmatpush3.msra.mxu1 %v3401_v37 }
 0x588   :  { %2856 = vmatprep.subr.mxu1 %v3235_v0  ;;  %v179_v30 = vpop.permute.xlu0 %178 }
 0x589   :  { %2857 = vmatpush3.msra.mxu1 %v3414_v39  ;;  %v187_v43 = vmul.f32 %v3357_v10, %v179_v30 }
 0x58a   :  { %2858 = vmatprep.subr.mxu1 %v3235_v0 }
 0x58b   :  { %2859 = vmatpush3.msra.mxu1 %v3425_v40  ;;  %v188_v45 = vadd.f32 %v187_v43, %v3363_v15 }
 0x58c   :  { %2874 = vmatprep.subr.mxu1 %v3235_v0 }
 0x63a   :  { %v812_v29 = vpop.f32.mrf.mxu0 }
 0x63c   :  { %v737_v31 = vpop.f32.mrf.mxu1  ;;  %v2829_v34 = vpop.f32.mrf.mxu0 }
 0x63d   :  { %v813_v41 = vadd.f32 %v812_v29, %v737_v31 }
 0x63e   :  { %v2818_v42 = vpop.f32.mrf.mxu1 }
 0x63f   :  { %v816_v44 = vadd.f32 %v3470_v49, %v813_v41 }
 0x641   :  { %3072 = vtanh.f32 %v816_v44  ;;  %v2596_v52 = vmul.f32 -1.442695, %v816_v44 }
 0x644   :  { %v908_v46 = vpop.f32.mrf.mxu1 }
 0x645   :  { %v912_v47 = vadd.f32 %v908_v46, %v188_v45 }
 0x646   :  { %v2840_v48 = vpop.f32.mrf.mxu1 }
 0x647   :  { %3074 = vtanh.f32 %v912_v47  ;;  %v2598_v53 = vmul.f32 -1.442695, %v912_v47 }
 0x648   :  { %3076 = vpow2.f32 %v2596_v52 }
 0x649   :  { %3078 = vpow2.f32 %v2598_v53 }
 0x64e   :  { %v3073_v50 = vpop.eup %3072 }
 0x64f   :  { %826 = vrot.lane.b32.xlu1 %v3073_v50, %s3238_s19 }
 0x654   :  { %v3075_v51 = vpop.eup %3074 }
 0x655   :  { %922 = vrot.lane.b32.xlu0 %v3075_v51, %s3238_s19  ;;  %v3077_v54 = vpop.eup %3076 }
 0x656   :  { %v820_v55 = vadd.f32 1.0, %v3077_v54  ;;  %v3079_v56 = vpop.eup %3078 }
 0x657   :  { %v916_v57 = vadd.f32 1.0, %v3079_v56 }
 0x658   :  { %3080 = vrcp.f32 %v820_v55 }
 0x659   :  { %3082 = vrcp.f32 %v916_v57 }
 0x665   :  { %v3081_v58 = vpop.eup %3080 }
 0x666   :  { %v3083_v61 = vpop.eup %3082  ;;  %v824_v1 = vmul.f32 %v3081_v58, %v3481_v19 }
 0x667   :  { %v920_v6 = vmul.f32 %v3083_v61, %v3478_v16 }
 0x6c1   :  { %v827_v59 = vpop.permute.xlu1 %826 }
 0x6c2   :  { %v829_v60 = vmul.f32 %v3081_v58, %v827_v59 }
 0x6c4   :  { %831 = vrot.lane.b32.xlu1 %v829_v60, %s3239_s4 }
 0x6c7   :  { %v923_v62 = vpop.permute.xlu0 %922 }
 0x6c8   :  { %v925_v63 = vmul.f32 %v3083_v61, %v923_v62 }
 0x6ca   :  { %927 = vrot.lane.b32.xlu0 %v925_v63, %s3239_s4 }
 0x736   :  { %v832_v2 = vpop.permute.xlu1 %831 }
 0x737   :  { %v3532_v4 = vadd.f32 %v832_v2, %v824_v1 }
 0x739   :  { %3084 = vtanh.f32 %v3532_v4 }
 0x73c   :  { %v928_v8 = vpop.permute.xlu0 %927 }
 0x73d   :  { %v3536_v11 = vadd.f32 %v928_v8, %v920_v6 }
 0x73f   :  { %3086 = vtanh.f32 %v3536_v11 }
 0x746   :  { %v3085_v12 = vpop.eup %3084 }
 0x747   :  { %837 = vrot.lane.b32.xlu1 %v3085_v12, %s3238_s19 }
 0x74c   :  { %v3087_v13 = vpop.eup %3086 }
 0x74d   :  { %933 = vrot.lane.b32.xlu0 %v3087_v13, %s3238_s19 }
 0x7b9   :  { %v838_v14 = vpop.permute.xlu1 %837 }
 0x7ba   :  { %v840_v17 = vmul.f32 %v3081_v58, %v838_v14 }
 0x7bc   :  { %938 = vrot.lane.b32.xlu1 %v840_v17, %s3239_s4 }
 0x7bf   :  { %v934_v16 = vpop.permute.xlu0 %933 }
 0x7c0   :  { %v936_v19 = vmul.f32 %v3083_v61, %v934_v16  ;;  %196 = vperm.xlu1 %3047, %v2578_v18  }
 0x7c2   :  { %1013 = vrot.lane.b32.xlu0 %v936_v19, %s3239_s4 }
 0x82e   :  { %v939_v20 = vpop.permute.xlu1 %938 }
 0x82f   :  { %2850 = vmatmul.mubr.msk.f32.vlgmr.msra.gmra.mxu0 %vm301_vm3, %v939_v20 }
 0x830   :  { %2864 = vmatpush3.msra.mxu0 %v3316_v3  ;;  %2871 = vmatprep.mubr.msk.f32.mxu0 %vm3236_vm0, %v3235_v0 }
 0x831   :  { %2865 = vmatprep.subr.mxu0 %v3235_v0 }
 0x832   :  { %2866 = vmatpush3.msra.mxu0 %v3325_v5 }
 0x833   :  { %2867 = vmatprep.subr.mxu0 %v3235_v0 }
 0x834   :  { %v1014_v21 = vpop.permute.xlu0 %1013  ;;  %2868 = vmatpush3.msra.mxu0 %v3332_v7 }
 0x835   :  { %2861 = vmatmul.mubr.msk.f32.vlgmr.msra.gmra.mxu1 %vm301_vm3, %v1014_v21  ;;  %2869 = vmatprep.subr.mxu0 %v3235_v0 }
 0x836   :  { %2870 = vmatpush3.msra.mxu0 %v3342_v9  ;;  %2875 = vmatpush3.msra.mxu1 %v3375_v32 }
 0x837   :  { %2872 = vmatmul.mubr.msk.f32.vlgmr.msra.gmra.mxu0 %vm301_vm3, %v1014_v21  ;;  %2885 = vmatprep.subr.mxu0 %v3235_v0 }
 0x838   :  { %2876 = vmatprep.subr.mxu1 %v3235_v0  ;;  %2886 = vmatpush3.msra.mxu0 %v3389_v35 }
 0x839   :  { %2877 = vmatpush3.msra.mxu1 %v3380_v33  ;;  %2887 = vmatprep.subr.mxu0 %v3235_v0 }
 0x83a   :  { %2878 = vmatprep.subr.mxu1 %v3235_v0  ;;  %2888 = vmatpush3.msra.mxu0 %v3401_v37 }
 0x83b   :  { %2879 = vmatpush3.msra.mxu1 %v3395_v36  ;;  %2889 = vmatprep.subr.mxu0 %v3235_v0  ;;  %v197_v22 = vpop.permute.xlu1 %196 }
 0x83c   :  { %2880 = vmatprep.subr.mxu1 %v3235_v0  ;;  %2890 = vmatpush3.msra.mxu0 %v3414_v39  ;;  %v205_v25 = vmul.f32 %v3357_v10, %v197_v22 }
 0x83d   :  { %2881 = vmatpush3.msra.mxu1 %v3409_v38  ;;  %2891 = vmatprep.subr.mxu0 %v3235_v0 }
 0x83e   :  { %2882 = vmatprep.mubr.msk.f32.mxu1 %vm3236_vm0, %v3235_v0  ;;  %2892 = vmatpush3.msra.mxu0 %v3425_v40  ;;  %v206_v28 = vadd.f32 %v205_v25, %v3363_v15 }
 0x83f   :  { %2893 = vmatprep.mubr.msk.f32.mxu0 %vm3236_vm0, %v3235_v0  ;;  %2896 = vmatprep.subr.mxu1 %v3235_v0 }
 0x840   :  { %2907 = vmatprep.subr.mxu0 %v3235_v0 }
 0x8ef   :  { %v1008_v23 = vpop.f32.mrf.mxu0 }
 0x8f1   :  { %v2851_v24 = vpop.f32.mrf.mxu0 }
 0x8f5   :  { %v1083_v26 = vpop.f32.mrf.mxu1 }
 0x8f6   :  { %v1084_v27 = vadd.f32 %v1083_v26, %v1008_v23 }
 0x8f7   :  { %v2862_v29 = vpop.f32.mrf.mxu1  ;;  %v1179_v30 = vpop.f32.mrf.mxu0 }
 0x8f8   :  { %v1087_v31 = vadd.f32 %v3470_v49, %v1084_v27  ;;  %v1183_v34 = vadd.f32 %v1179_v30, %v206_v28 }
 0x8f9   :  { %v2873_v41 = vpop.f32.mrf.mxu0 }
 0x8fa   :  { %3088 = vtanh.f32 %v1087_v31  ;;  %v2601_v44 = vmul.f32 -1.442695, %v1087_v31  ;;  %v2603_v45 = vmul.f32 -1.442695, %v1183_v34 }
 0x8fb   :  { %3090 = vtanh.f32 %v1183_v34 }
 0x8fc   :  { %3092 = vpow2.f32 %v2601_v44 }
 0x8fd   :  { %3094 = vpow2.f32 %v2603_v45 }
 0x907   :  { %v3089_v42 = vpop.eup %3088 }
 0x908   :  { %v3091_v43 = vpop.eup %3090  ;;  %1097 = vrot.lane.b32.xlu0 %v3089_v42, %s3238_s19 }
 0x909   :  { %1193 = vrot.lane.b32.xlu1 %v3091_v43, %s3238_s19  ;;  %v3093_v46 = vpop.eup %3092 }
 0x90a   :  { %v3095_v47 = vpop.eup %3094  ;;  %v1091_v48 = vadd.f32 1.0, %v3093_v46 }
 0x90b   :  { %v1187_v50 = vadd.f32 1.0, %v3095_v47 }
 0x90c   :  { %3096 = vrcp.f32 %v1091_v48 }
 0x90d   :  { %3098 = vrcp.f32 %v1187_v50 }
 0x919   :  { %v3097_v51 = vpop.eup %3096 }
 0x91a   :  { %v3099_v53 = vpop.eup %3098  ;;  %v1095_v57 = vmul.f32 %v3097_v51, %v3532_v4 }
 0x91b   :  { %v1191_v59 = vmul.f32 %v3099_v53, %v3536_v11  ;;  %v2580_v11 = vld [vmem:[%s3883_s0 + $0x20] sm:$0xff] }
 0x97a   :  { %v1098_v52 = vpop.permute.xlu0 %1097 }
 0x97b   :  { %v1100_v54 = vmul.f32 %v3097_v51, %v1098_v52  ;;  %v1194_v55 = vpop.permute.xlu1 %1193 }
 0x97c   :  { %v1196_v56 = vmul.f32 %v3099_v53, %v1194_v55 }
 0x97d   :  { %1102 = vrot.lane.b32.xlu0 %v1100_v54, %s3239_s4 }
 0x97e   :  { %1198 = vrot.lane.b32.xlu1 %v1196_v56, %s3239_s4 }
 0x9ef   :  { %v1103_v58 = vpop.permute.xlu0 %1102 }
 0x9f0   :  { %v3588_v60 = vadd.f32 %v1103_v58, %v1095_v57  ;;  %v1199_v61 = vpop.permute.xlu1 %1198 }
 0x9f1   :  { %v3590_v62 = vadd.f32 %v1199_v61, %v1191_v59 }
 0x9f2   :  { %3100 = vtanh.f32 %v3588_v60 }
 0x9f3   :  { %3102 = vtanh.f32 %v3590_v62 }
 0x9ff   :  { %v3101_v63 = vpop.eup %3100 }
 0xa00   :  { %v3103_v1 = vpop.eup %3102  ;;  %1108 = vrot.lane.b32.xlu0 %v3101_v63, %s3238_s19 }
 0xa01   :  { %1204 = vrot.lane.b32.xlu1 %v3103_v1, %s3238_s19 }
 0xa72   :  { %v1109_v2 = vpop.permute.xlu0 %1108 }
 0xa73   :  { %v1111_v4 = vmul.f32 %v3097_v51, %v1109_v2  ;;  %v1205_v6 = vpop.permute.xlu1 %1204 }
 0xa74   :  { %v1207_v8 = vmul.f32 %v3099_v53, %v1205_v6 }
 0xa75   :  { %1209 = vrot.lane.b32.xlu0 %v1111_v4, %s3239_s4 }
 0xa76   :  { %1284 = vrot.lane.b32.xlu1 %v1207_v8, %s3239_s4 }
 0xa79   :  { %214 = vperm.xlu0 %3046, %v2580_v11  }
 0xae7   :  { %v1210_v12 = vpop.permute.xlu0 %1209 }
 0xae8   :  { %v1285_v13 = vpop.permute.xlu1 %1284  ;;  %2883 = vmatmul.mubr.msk.f32.vlgmr.msra.gmra.mxu1 %vm301_vm3, %v1210_v12 }
 0xae9   :  { %2894 = vmatmul.mubr.msk.f32.vlgmr.msra.gmra.mxu0 %vm301_vm3, %v1285_v13  ;;  %2897 = vmatpush3.msra.mxu1 %v3316_v3 }
 0xaea   :  { %2898 = vmatprep.subr.mxu1 %v3235_v0  ;;  %2904 = vmatprep.mubr.msk.f32.mxu1 %vm3236_vm0, %v3235_v0 }
 0xaeb   :  { %2899 = vmatpush3.msra.mxu1 %v3325_v5  ;;  %2908 = vmatpush3.msra.mxu0 %v3375_v32 }
 0xaec   :  { %2900 = vmatprep.subr.mxu1 %v3235_v0  ;;  %2909 = vmatprep.subr.mxu0 %v3235_v0 }
 0xaed   :  { %2901 = vmatpush3.msra.mxu1 %v3332_v7  ;;  %2910 = vmatpush3.msra.mxu0 %v3380_v33 }
 0xaee   :  { %2902 = vmatprep.subr.mxu1 %v3235_v0  ;;  %2911 = vmatprep.subr.mxu0 %v3235_v0 }
 0xaef   :  { %2903 = vmatpush3.msra.mxu1 %v3342_v9  ;;  %2912 = vmatpush3.msra.mxu0 %v3395_v36 }
 0xaf0   :  { %2905 = vmatmul.mubr.msk.f32.vlgmr.msra.gmra.mxu1 %vm301_vm3, %v1285_v13  ;;  %2913 = vmatprep.subr.mxu0 %v3235_v0 }
 0xaf1   :  { %2918 = vmatprep.subr.mxu1 %v3235_v0  ;;  %2914 = vmatpush3.msra.mxu0 %v3409_v38 }
 0xaf2   :  { %2919 = vmatpush3.msra.mxu1 %v3389_v35  ;;  %2915 = vmatprep.mubr.msk.f32.mxu0 %vm3236_vm0, %v3235_v0 }
 0xaf3   :  { %2920 = vmatprep.subr.mxu1 %v3235_v0  ;;  %2929 = vmatprep.subr.mxu0 %v3235_v0 }
 0xaf4   :  { %2921 = vmatpush3.msra.mxu1 %v3401_v37  ;;  %2926 = vmatprep.mubr.msk.f32.mxu1 %vm3236_vm0, %v3235_v0  ;;  %v215_v14 = vpop.permute.xlu0 %214 }
 0xaf5   :  { %2922 = vmatprep.subr.mxu1 %v3235_v0  ;;  %v223_v20 = vmul.f32 %v3357_v10, %v215_v14 }
 0xaf6   :  { %2923 = vmatpush3.msra.mxu1 %v3414_v39 }
 0xaf7   :  { %2924 = vmatprep.subr.mxu1 %v3235_v0  ;;  %v224_v23 = vadd.f32 %v223_v20, %v3363_v15 }
 0xaf8   :  { %2925 = vmatpush3.msra.mxu1 %v3425_v40 }
 0xaf9   :  { %2940 = vmatprep.subr.mxu1 %v3235_v0 }
 0xba8   :  { %v1279_v17 = vpop.f32.mrf.mxu1 }
 0xba9   :  { %v1354_v18 = vpop.f32.mrf.mxu0 }
 0xbaa   :  { %v1355_v16 = vadd.f32 %v1354_v18, %v1279_v17  ;;  %v2884_v19 = vpop.f32.mrf.mxu1 }
 0xbab   :  { %v2895_v21 = vpop.f32.mrf.mxu0 }
 0xbac   :  { %v1358_v22 = vadd.f32 %v3470_v49, %v1355_v16 }
 0xbae   :  { %3104 = vtanh.f32 %v1358_v22  ;;  %v2606_v29 = vmul.f32 -1.442695, %v1358_v22 }
 0xbb0   :  { %v1450_v24 = vpop.f32.mrf.mxu1 }
 0xbb1   :  { %v1454_v25 = vadd.f32 %v1450_v24, %v224_v23 }
 0xbb2   :  { %v2906_v26 = vpop.f32.mrf.mxu1 }
 0xbb3   :  { %3106 = vtanh.f32 %v1454_v25  ;;  %v2608_v30 = vmul.f32 -1.442695, %v1454_v25 }
 0xbb4   :  { %3108 = vpow2.f32 %v2606_v29 }
 0xbb5   :  { %3110 = vpow2.f32 %v2608_v30 }
 0xbbb   :  { %v3105_v27 = vpop.eup %3104 }
 0xbbc   :  { %1368 = vrot.lane.b32.xlu1 %v3105_v27, %s3238_s19 }
 0xbc0   :  { %v3107_v28 = vpop.eup %3106 }
 0xbc1   :  { %1464 = vrot.lane.b32.xlu0 %v3107_v28, %s3238_s19  ;;  %v3109_v31 = vpop.eup %3108 }
 0xbc2   :  { %v1362_v34 = vadd.f32 1.0, %v3109_v31  ;;  %v3111_v41 = vpop.eup %3110 }
 0xbc3   :  { %v1458_v42 = vadd.f32 1.0, %v3111_v41 }
 0xbc4   :  { %3112 = vrcp.f32 %v1362_v34 }
 0xbc5   :  { %3114 = vrcp.f32 %v1458_v42 }
 0xbd1   :  { %v3113_v43 = vpop.eup %3112 }
 0xbd2   :  { %v3115_v46 = vpop.eup %3114  ;;  %v1366_v50 = vmul.f32 %v3113_v43, %v3588_v60  ;;  %v2582_v60 = vld [vmem:[%s3883_s0 + $0x28] sm:$0xff] }
 0xbd3   :  { %v1462_v53 = vmul.f32 %v3115_v46, %v3590_v62 }
 0xc2e   :  { %v1369_v44 = vpop.permute.xlu1 %1368 }
 0xc2f   :  { %v1371_v45 = vmul.f32 %v3113_v43, %v1369_v44 }
 0xc31   :  { %1373 = vrot.lane.b32.xlu1 %v1371_v45, %s3239_s4 }
 0xc33   :  { %v1465_v47 = vpop.permute.xlu0 %1464 }
 0xc34   :  { %v1467_v48 = vmul.f32 %v3115_v46, %v1465_v47 }
 0xc36   :  { %1469 = vrot.lane.b32.xlu0 %v1467_v48, %s3239_s4 }
 0xca3   :  { %v1374_v51 = vpop.permute.xlu1 %1373 }
 0xca4   :  { %v3642_v52 = vadd.f32 %v1374_v51, %v1366_v50  ;;  %v2584_v50 = vld [vmem:[%s3883_s0 + $0x30] sm:$0xff] }
 0xca6   :  { %3116 = vtanh.f32 %v3642_v52 }
 0xca8   :  { %v1470_v54 = vpop.permute.xlu0 %1469 }
 0xca9   :  { %v3646_v55 = vadd.f32 %v1470_v54, %v1462_v53  ;;  %v3716_v53 = vld [vmem:[%s3888_s5 + $0x18] sm:$0xff]  ;;  %v3725_v54 = vld [vmem:[%s3888_s5 + $0x10] sm:$0xff] }
 0xcab   :  { %3118 = vtanh.f32 %v3646_v55 }
 0xcb3   :  { %v3117_v56 = vpop.eup %3116 }
 0xcb4   :  { %1379 = vrot.lane.b32.xlu1 %v3117_v56, %s3238_s19 }
 0xcb8   :  { %v3119_v57 = vpop.eup %3118 }
 0xcb9   :  { %1475 = vrot.lane.b32.xlu0 %v3119_v57, %s3238_s19 }
 0xd26   :  { %v1380_v58 = vpop.permute.xlu1 %1379 }
 0xd27   :  { %v1382_v59 = vmul.f32 %v3113_v43, %v1380_v58 }
 0xd29   :  { %1480 = vrot.lane.b32.xlu1 %v1382_v59, %s3239_s4 }
 0xd2b   :  { %v1476_v61 = vpop.permute.xlu0 %1475 }
 0xd2c   :  { %v1478_v62 = vmul.f32 %v3115_v46, %v1476_v61 }
 0xd2d   :  { %232 = vperm.xlu1 %3047, %v2582_v60  }
 0xd2e   :  { %1555 = vrot.lane.b32.xlu0 %v1478_v62, %s3239_s4 }
 0xd9b   :  { %v1481_v63 = vpop.permute.xlu1 %1480 }
 0xd9c   :  { %2916 = vmatmul.mubr.msk.f32.vlgmr.msra.gmra.mxu0 %vm301_vm3, %v1481_v63 }
 0xd9d   :  { %2930 = vmatpush3.msra.mxu0 %v3316_v3  ;;  %2937 = vmatprep.mubr.msk.f32.mxu0 %vm3236_vm0, %v3235_v0 }
 0xd9e   :  { %2931 = vmatprep.subr.mxu0 %v3235_v0 }
 0xd9f   :  { %2932 = vmatpush3.msra.mxu0 %v3325_v5 }
 0xda0   :  { %2933 = vmatprep.subr.mxu0 %v3235_v0  ;;  %v1556_v1 = vpop.permute.xlu0 %1555 }
 0xda1   :  { %2934 = vmatpush3.msra.mxu0 %v3332_v7  ;;  %2927 = vmatmul.mubr.msk.f32.vlgmr.msra.gmra.mxu1 %vm301_vm3, %v1556_v1 }
 0xda2   :  { %2935 = vmatprep.subr.mxu0 %v3235_v0  ;;  %2941 = vmatpush3.msra.mxu1 %v3375_v32 }
 0xda3   :  { %2936 = vmatpush3.msra.mxu0 %v3342_v9  ;;  %2942 = vmatprep.subr.mxu1 %v3235_v0 }
 0xda4   :  { %2938 = vmatmul.mubr.msk.f32.vlgmr.msra.gmra.mxu0 %vm301_vm3, %v1556_v1  ;;  %2951 = vmatprep.subr.mxu0 %v3235_v0 }
 0xda5   :  { %2952 = vmatpush3.msra.mxu0 %v3389_v35  ;;  %2943 = vmatpush3.msra.mxu1 %v3380_v33 }
 0xda6   :  { %2953 = vmatprep.subr.mxu0 %v3235_v0  ;;  %2944 = vmatprep.subr.mxu1 %v3235_v0 }
 0xda7   :  { %2954 = vmatpush3.msra.mxu0 %v3401_v37  ;;  %2945 = vmatpush3.msra.mxu1 %v3395_v36 }
 0xda8   :  { %2955 = vmatprep.subr.mxu0 %v3235_v0  ;;  %2946 = vmatprep.subr.mxu1 %v3235_v0  ;;  %v233_v3 = vpop.permute.xlu1 %232 }
 0xda9   :  { %2956 = vmatpush3.msra.mxu0 %v3414_v39  ;;  %2947 = vmatpush3.msra.mxu1 %v3409_v38  ;;  %v241_v9 = vmul.f32 %v3357_v10, %v233_v3 }
 0xdaa   :  { %2957 = vmatprep.subr.mxu0 %v3235_v0  ;;  %2948 = vmatprep.mubr.msk.f32.mxu1 %vm3236_vm0, %v3235_v0 }
 0xdab   :  { %2958 = vmatpush3.msra.mxu0 %v3425_v40  ;;  %2959 = vmatprep.mubr.msk.f32.mxu0 %vm3236_vm0, %v3235_v0  ;;  %v242_v8 = vadd.f32 %v241_v9, %v3363_v15 }
 0xdac   :  { %2962 = vmatprep.subr.mxu1 %v3235_v0  ;;  %2973 = vmatprep.subr.mxu0 %v3235_v0 }
 0xe5c   :  { %v1550_v5 = vpop.f32.mrf.mxu0 }
 0xe5e   :  { %v2917_v7 = vpop.f32.mrf.mxu0 }
 0xe61   :  { %v1625_v2 = vpop.f32.mrf.mxu1 }
 0xe62   :  { %v1626_v4 = vadd.f32 %v1625_v2, %v1550_v5 }
 0xe63   :  { %v2928_v6 = vpop.f32.mrf.mxu1 }
 0xe64   :  { %v1629_v11 = vadd.f32 %v3470_v49, %v1626_v4  ;;  %v1721_v12 = vpop.f32.mrf.mxu0 }
 0xe65   :  { %v1725_v13 = vadd.f32 %v1721_v12, %v242_v8 }
 0xe66   :  { %3120 = vtanh.f32 %v1629_v11  ;;  %v2939_v14 = vpop.f32.mrf.mxu0  ;;  %v2611_v16 = vmul.f32 -1.442695, %v1629_v11 }
 0xe67   :  { %3122 = vtanh.f32 %v1725_v13  ;;  %v2613_v10 = vmul.f32 -1.442695, %v1725_v13 }
 0xe68   :  { %3124 = vpow2.f32 %v2611_v16 }
 0xe69   :  { %3126 = vpow2.f32 %v2613_v10 }
 0xe73   :  { %v3121_v17 = vpop.eup %3120 }
 0xe74   :  { %v3123_v18 = vpop.eup %3122  ;;  %1639 = vrot.lane.b32.xlu0 %v3121_v17, %s3238_s19 }
 0xe75   :  { %1735 = vrot.lane.b32.xlu1 %v3123_v18, %s3238_s19  ;;  %v3125_v19 = vpop.eup %3124 }
 0xe76   :  { %v3127_v20 = vpop.eup %3126  ;;  %v1633_v21 = vadd.f32 1.0, %v3125_v19 }
 0xe77   :  { %v1729_v22 = vadd.f32 1.0, %v3127_v20 }
 0xe78   :  { %3128 = vrcp.f32 %v1633_v21 }
 0xe79   :  { %3130 = vrcp.f32 %v1729_v22 }
 0xe85   :  { %v3129_v23 = vpop.eup %3128 }
 0xe86   :  { %v3131_v25 = vpop.eup %3130  ;;  %v1637_v29 = vmul.f32 %v3129_v23, %v3642_v52 }
 0xe87   :  { %v1733_v31 = vmul.f32 %v3131_v25, %v3646_v55  ;;  %v3734_v55 = vld [vmem:[%s3888_s5 + $0x8] sm:$0xff] }
 0xee6   :  { %v1640_v24 = vpop.permute.xlu0 %1639 }
 0xee7   :  { %v1642_v26 = vmul.f32 %v3129_v23, %v1640_v24  ;;  %v1736_v27 = vpop.permute.xlu1 %1735 }
 0xee8   :  { %v1738_v28 = vmul.f32 %v3131_v25, %v1736_v27 }
 0xee9   :  { %1644 = vrot.lane.b32.xlu0 %v1642_v26, %s3239_s4 }
 0xeea   :  { %1740 = vrot.lane.b32.xlu1 %v1738_v28, %s3239_s4  ;;  %v3181_v28 = vld [vmem:[%s3890_s7 + $0x18] sm:$0xff] }
 0xf5b   :  { %v1645_v30 = vpop.permute.xlu0 %1644 }
 0xf5c   :  { %v3698_v34 = vadd.f32 %v1645_v30, %v1637_v29  ;;  %v1741_v41 = vpop.permute.xlu1 %1740  ;;  %v3182_v29 = vld [vmem:[%s3889_s6 + $0x18] sm:$0xff]  ;;  %v3183_v30 = vld [vmem:[%s3890_s7 + $0x10] sm:$0xff] }
 0xf5d   :  { %v3700_v42 = vadd.f32 %v1741_v41, %v1733_v31  ;;  %v3184_v31 = vld [vmem:[%s3889_s6 + $0x10] sm:$0xff]  ;;  %v3186_v41 = vld [vmem:[%s3889_s6 + $0x8] sm:$0xff] }
 0xf5e   :  { %3132 = vtanh.f32 %v3698_v34 }
 0xf5f   :  { %3134 = vtanh.f32 %v3700_v42 }
 0xf6b   :  { %v3133_v43 = vpop.eup %3132 }
 0xf6c   :  { %v3135_v44 = vpop.eup %3134  ;;  %1650 = vrot.lane.b32.xlu0 %v3133_v43, %s3238_s19  ;;  %v3188_v43 = vld [vmem:[%s3889_s6] sm:$0xff] }
 0xf6d   :  { %1746 = vrot.lane.b32.xlu1 %v3135_v44, %s3238_s19  ;;  %v2587_v44 = vld [vmem:[%s3885_s2] ss:$0 sm:$0xff] }
 0xfde   :  { %v1651_v45 = vpop.permute.xlu0 %1650 }
 0xfdf   :  { %v1653_v46 = vmul.f32 %v3129_v23, %v1651_v45  ;;  %v1747_v47 = vpop.permute.xlu1 %1746  ;;  %v2586_v23 = vld [vmem:[%s3883_s0 + $0x38] sm:$0xff] }
 0xfe0   :  { %v1749_v48 = vmul.f32 %v3131_v25, %v1747_v47 }
 0xfe1   :  { %1751 = vrot.lane.b32.xlu0 %v1653_v46, %s3239_s4 }
 0xfe2   :  { %1826 = vrot.lane.b32.xlu1 %v1749_v48, %s3239_s4 }
 0xfe5   :  { %250 = vperm.xlu0 %3046, %v2584_v50  }
0x1053   :  { %v1752_v51 = vpop.permute.xlu0 %1751 }
0x1054   :  { %v1827_v52 = vpop.permute.xlu1 %1826  ;;  %2949 = vmatmul.mubr.msk.f32.vlgmr.msra.gmra.mxu1 %vm301_vm3, %v1752_v51 }
0x1055   :  { %2960 = vmatmul.mubr.msk.f32.vlgmr.msra.gmra.mxu0 %vm301_vm3, %v1827_v52  ;;  %2963 = vmatpush3.msra.mxu1 %v3716_v53 }
0x1056   :  { %2964 = vmatprep.subr.mxu1 %v3235_v0  ;;  %2970 = vmatprep.mubr.msk.f32.mxu1 %vm3236_vm0, %v3235_v0 }
0x1057   :  { %2965 = vmatpush3.msra.mxu1 %v3725_v54  ;;  %2974 = vmatpush3.msra.mxu0 %v3375_v32  ;;  %v3743_v32 = vld [vmem:[%s3888_s5] sm:$0xff] }
0x1058   :  { %2966 = vmatprep.subr.mxu1 %v3235_v0  ;;  %2975 = vmatprep.subr.mxu0 %v3235_v0 }
0x1059   :  { %2967 = vmatpush3.msra.mxu1 %v3734_v55  ;;  %2976 = vmatpush3.msra.mxu0 %v3380_v33 }
0x105a   :  { %2968 = vmatprep.subr.mxu1 %v3235_v0  ;;  %2977 = vmatprep.subr.mxu0 %v3235_v0 }
0x105b   :  { %2969 = vmatpush3.msra.mxu1 %v3743_v32  ;;  %2978 = vmatpush3.msra.mxu0 %v3395_v36 }
0x105c   :  { %2971 = vmatmul.mubr.msk.f32.vlgmr.msra.gmra.mxu1 %vm301_vm3, %v1827_v52  ;;  %2979 = vmatprep.subr.mxu0 %v3235_v0 }
0x105d   :  { %2984 = vmatprep.subr.mxu1 %v3235_v0  ;;  %2980 = vmatpush3.msra.mxu0 %v3409_v38 }
0x105e   :  { %2985 = vmatpush3.msra.mxu1 %v3389_v35  ;;  %2981 = vmatprep.mubr.msk.f32.mxu0 %vm3236_vm0, %v3235_v0 }
0x105f   :  { %2986 = vmatprep.subr.mxu1 %v3235_v0  ;;  %2995 = vmatprep.subr.mxu0 %v3235_v0 }
0x1060   :  { %2987 = vmatpush3.msra.mxu1 %v3401_v37  ;;  %2992 = vmatprep.mubr.msk.f32.mxu1 %vm3236_vm0, %v3235_v0  ;;  %v251_v33 = vpop.permute.xlu0 %250  ;;  %v3180_v37 = vld [vmem:[%s3885_s2] ss:$0 sm:$0xff] }
0x1061   :  { %2988 = vmatprep.subr.mxu1 %v3235_v0  ;;  %v259_v57 = vmul.f32 %v3180_v37, %v251_v33 }
0x1062   :  { %2989 = vmatpush3.msra.mxu1 %v3414_v39 }
0x1063   :  { %2990 = vmatprep.subr.mxu1 %v3235_v0  ;;  %v260_v39 = vadd.f32 %v259_v57, %v3363_v15 }
0x1064   :  { %2991 = vmatpush3.msra.mxu1 %v3425_v40 }
0x1065   :  { %3006 = vmatprep.subr.mxu1 %v3235_v0 }
0x1114   :  { %v1821_v35 = vpop.f32.mrf.mxu1 }
0x1115   :  { %v1896_v36 = vpop.f32.mrf.mxu0 }
0x1116   :  { %v1897_v38 = vadd.f32 %v1896_v36, %v1821_v35  ;;  %v2950_v56 = vpop.f32.mrf.mxu1 }
0x1117   :  { %v2961_v58 = vpop.f32.mrf.mxu0 }
0x1118   :  { %v1900_v59 = vadd.f32 %v3470_v49, %v1897_v38 }
0x111a   :  { %3136 = vtanh.f32 %v1900_v59  ;;  %v2616_v1 = vmul.f32 -1.442695, %v1900_v59 }
0x111c   :  { %v1992_v60 = vpop.f32.mrf.mxu1 }
0x111d   :  { %v1996_v40 = vadd.f32 %v1992_v60, %v260_v39 }
0x111e   :  { %v2972_v61 = vpop.f32.mrf.mxu1 }
0x111f   :  { %3138 = vtanh.f32 %v1996_v40  ;;  %v2618_v3 = vmul.f32 -1.442695, %v1996_v40 }
0x1120   :  { %3140 = vpow2.f32 %v2616_v1 }
0x1121   :  { %3142 = vpow2.f32 %v2618_v3 }
0x1127   :  { %v3137_v62 = vpop.eup %3136 }
0x1128   :  { %1910 = vrot.lane.b32.xlu1 %v3137_v62, %s3238_s19 }
0x112c   :  { %v3139_v63 = vpop.eup %3138 }
0x112d   :  { %2006 = vrot.lane.b32.xlu0 %v3139_v63, %s3238_s19  ;;  %v3141_v5 = vpop.eup %3140 }
0x112e   :  { %v1904_v7 = vadd.f32 1.0, %v3141_v5  ;;  %v3143_v49 = vpop.eup %3142 }
0x112f   :  { %v2000_v9 = vadd.f32 1.0, %v3143_v49 }
0x1130   :  { %3144 = vrcp.f32 %v1904_v7 }
0x1131   :  { %3146 = vrcp.f32 %v2000_v9 }
0x113d   :  { %v3145_v2 = vpop.eup %3144 }
0x113e   :  { %v3147_v8 = vpop.eup %3146  ;;  %v1908_v13 = vmul.f32 %v3145_v2, %v3698_v34  ;;  %v3185_v34 = vld [vmem:[%s3890_s7 + $0x8] sm:$0xff] }
0x113f   :  { %v2004_v18 = vmul.f32 %v3147_v8, %v3700_v42  ;;  %v3187_v42 = vld [vmem:[%s3890_s7] sm:$0xff] }
0x119a   :  { %v1911_v4 = vpop.permute.xlu1 %1910 }
0x119b   :  { %v1913_v6 = vmul.f32 %v3145_v2, %v1911_v4 }
0x119d   :  { %1915 = vrot.lane.b32.xlu1 %v1913_v6, %s3239_s4 }
0x119f   :  { %v2007_v11 = vpop.permute.xlu0 %2006 }
0x11a0   :  { %v2009_v12 = vmul.f32 %v3147_v8, %v2007_v11 }
0x11a2   :  { %2011 = vrot.lane.b32.xlu0 %v2009_v12, %s3239_s4 }
0x120f   :  { %v1916_v14 = vpop.permute.xlu1 %1915 }
0x1210   :  { %v3774_v17 = vadd.f32 %v1916_v14, %v1908_v13 }
0x1212   :  { %3148 = vtanh.f32 %v3774_v17 }
0x1214   :  { %v2012_v16 = vpop.permute.xlu0 %2011 }
0x1215   :  { %v3778_v10 = vadd.f32 %v2012_v16, %v2004_v18 }
0x1217   :  { %3150 = vtanh.f32 %v3778_v10 }
0x121f   :  { %v3149_v19 = vpop.eup %3148 }
0x1220   :  { %1921 = vrot.lane.b32.xlu1 %v3149_v19, %s3238_s19 }
0x1224   :  { %v3151_v20 = vpop.eup %3150 }
0x1225   :  { %2017 = vrot.lane.b32.xlu0 %v3151_v20, %s3238_s19 }
0x1292   :  { %v1922_v21 = vpop.permute.xlu1 %1921 }
0x1293   :  { %v1924_v22 = vmul.f32 %v3145_v2, %v1922_v21 }
0x1295   :  { %2022 = vrot.lane.b32.xlu1 %v1924_v22, %s3239_s4 }
0x1297   :  { %v2018_v24 = vpop.permute.xlu0 %2017 }
0x1298   :  { %v2020_v25 = vmul.f32 %v3147_v8, %v2018_v24 }
0x1299   :  { %268 = vperm.xlu1 %3047, %v2586_v23  }
0x129a   :  { %2097 = vrot.lane.b32.xlu0 %v2020_v25, %s3239_s4 }
0x1307   :  { %v2023_v26 = vpop.permute.xlu1 %2022 }
0x1308   :  { %2982 = vmatmul.mubr.msk.f32.vlgmr.msra.gmra.mxu0 %vm301_vm3, %v2023_v26 }
0x1309   :  { %2996 = vmatpush3.msra.mxu0 %v3716_v53  ;;  %3003 = vmatprep.mubr.msk.f32.mxu0 %vm3236_vm0, %v3235_v0 }
0x130a   :  { %2997 = vmatprep.subr.mxu0 %v3235_v0 }
0x130b   :  { %2998 = vmatpush3.msra.mxu0 %v3725_v54  ;;  %v3189_v54 = vld [vmem:[%s3891_s8] ss:$0 sm:$0xff] }
0x130c   :  { %2999 = vmatprep.subr.mxu0 %v3235_v0  ;;  %v2098_v27 = vpop.permute.xlu0 %2097 }
0x130d   :  { %3000 = vmatpush3.msra.mxu0 %v3734_v55  ;;  %2993 = vmatmul.mubr.msk.f32.vlgmr.msra.gmra.mxu1 %vm301_vm3, %v2098_v27 }
0x130e   :  { %3001 = vmatprep.subr.mxu0 %v3235_v0  ;;  %3007 = vmatpush3.msra.mxu1 %v3181_v28 }
0x130f   :  { %3002 = vmatpush3.msra.mxu0 %v3743_v32  ;;  %3008 = vmatprep.subr.mxu1 %v3235_v0 }
0x1310   :  { %3004 = vmatmul.mubr.msk.f32.vlgmr.msra.gmra.mxu0 %vm301_vm3, %v2098_v27  ;;  %3017 = vmatprep.subr.mxu0 %v3235_v0 }
0x1311   :  { %3018 = vmatpush3.msra.mxu0 %v3182_v29  ;;  %3009 = vmatpush3.msra.mxu1 %v3183_v30 }
0x1312   :  { %3019 = vmatprep.subr.mxu0 %v3235_v0  ;;  %3010 = vmatprep.subr.mxu1 %v3235_v0 }
0x1313   :  { %3020 = vmatpush3.msra.mxu0 %v3184_v31  ;;  %3011 = vmatpush3.msra.mxu1 %v3185_v34  ;;  %v2470_v31 = vld [vmem:[%s3892_s9 + $0x18] sm:$0xff]  ;;  %v2469_v34 = vld [vmem:[%s3892_s9 + $0x10] sm:$0xff] }
0x1314   :  { %3021 = vmatprep.subr.mxu0 %v3235_v0  ;;  %3012 = vmatprep.subr.mxu1 %v3235_v0  ;;  %v269_v45 = vpop.permute.xlu1 %268 }
0x1315   :  { %3022 = vmatpush3.msra.mxu0 %v3186_v41  ;;  %3013 = vmatpush3.msra.mxu1 %v3187_v42  ;;  %v277_v48 = vmul.f32 %v2587_v44, %v269_v45  ;;  %v2468_v41 = vld [vmem:[%s3892_s9 + $0x8] sm:$0xff]  ;;  %v2467_v42 = vld [vmem:[%s3892_s9] sm:$0xff]  ;;  %s2561_s9 = sshll.u32 %s3240_s23, 4  ;;  %s2562_s9 = int_to_ptr.vmem [resolvable:$true] %s2561_s9 }
0x1316   :  { %3023 = vmatprep.subr.mxu0 %v3235_v0  ;;  %3014 = vmatprep.mubr.msk.f32.mxu1 %vm3236_vm0, %v3235_v0  ;;  %p3215_p6 = scmp.lt.s32.totalorder %s2562_s9, %s2562_s9 }
0x1317   :  { %3024 = vmatpush3.msra.mxu0 %v3188_v43  ;;  %3025 = vmatprep.mubr.msk.f32.mxu0 %vm3236_vm0, %v3235_v0  ;;  %v278_v53 = vadd.f32 %v277_v48, %v3363_v15 }
0x1318   :  { %3028 = vmatprep.subr.mxu1 %v3235_v0 }
0x13c8   :  { %v2092_v46 = vpop.f32.mrf.mxu0 }
0x13ca   :  { %v2983_v47 = vpop.f32.mrf.mxu0 }
0x13cb   :  { %v2627_v47 = vld [vmem:[%s3893_s10] ss:$0 sm:$0xff] }
0x13cd   :  { %v2167_v50 = vpop.f32.mrf.mxu1 }
0x13ce   :  { %v2168_v51 = vadd.f32 %v2167_v50, %v2092_v46 }
0x13cf   :  { %v2994_v52 = vpop.f32.mrf.mxu1 }
0x13d0   :  { %v2171_v55 = vadd.f32 %v3189_v54, %v2168_v51  ;;  %v2263_v32 = vpop.f32.mrf.mxu0 }
0x13d1   :  { %v2267_v33 = vadd.f32 %v2263_v32, %v278_v53 }
0x13d2   :  { %3152 = vtanh.f32 %v2171_v55  ;;  %v3005_v35 = vpop.f32.mrf.mxu0  ;;  %v2621_v56 = vmul.f32 -1.442695, %v2171_v55 }
0x13d3   :  { %3154 = vtanh.f32 %v2267_v33  ;;  %v2623_v37 = vmul.f32 -1.442695, %v2267_v33 }
0x13d4   :  { %3156 = vpow2.f32 %v2621_v56 }
0x13d5   :  { %3158 = vpow2.f32 %v2623_v37 }
0x13df   :  { %v3153_v36 = vpop.eup %3152 }
0x13e0   :  { %v3155_v38 = vpop.eup %3154  ;;  %2181 = vrot.lane.b32.xlu0 %v3153_v36, %s3238_s19 }
0x13e1   :  { %2277 = vrot.lane.b32.xlu1 %v3155_v38, %s3238_s19  ;;  %v3157_v15 = vpop.eup %3156 }
0x13e2   :  { %v3159_v57 = vpop.eup %3158  ;;  %v2175_v58 = vadd.f32 1.0, %v3157_v15 }
0x13e3   :  { %v2271_v59 = vadd.f32 1.0, %v3159_v57 }
0x13e4   :  { %3160 = vrcp.f32 %v2175_v58 }
0x13e5   :  { %3162 = vrcp.f32 %v2271_v59 }
0x13f1   :  { %v3161_v39 = vpop.eup %3160 }
0x13f2   :  { %v3163_v40 = vpop.eup %3162  ;;  %v2179_v1 = vmul.f32 %v3161_v39, %v3774_v17 }
0x13f3   :  { %v2275_v5 = vmul.f32 %v3163_v40, %v3778_v10 }
0x1452   :  { %v2182_v60 = vpop.permute.xlu0 %2181 }
0x1453   :  { %v2184_v61 = vmul.f32 %v3161_v39, %v2182_v60  ;;  %v2278_v62 = vpop.permute.xlu1 %2277 }
0x1454   :  { %v2280_v63 = vmul.f32 %v3163_v40, %v2278_v62 }
0x1455   :  { %2186 = vrot.lane.b32.xlu0 %v2184_v61, %s3239_s4 }
0x1456   :  { %2282 = vrot.lane.b32.xlu1 %v2280_v63, %s3239_s4 }
0x14c7   :  { %v2187_v3 = vpop.permute.xlu0 %2186 }
0x14c8   :  { %v2189_v7 = vadd.f32 %v2187_v3, %v2179_v1  ;;  %v2283_v49 = vpop.permute.xlu1 %2282 }
0x14c9   :  { %v2285_v9 = vadd.f32 %v2283_v49, %v2275_v5 }
0x14ca   :  { %3164 = vtanh.f32 %v2189_v7 }
0x14cb   :  { %3166 = vtanh.f32 %v2285_v9 }
0x14d7   :  { %v3165_v2 = vpop.eup %3164 }
0x14d8   :  { %v3167_v4 = vpop.eup %3166  ;;  %2192 = vrot.lane.b32.xlu0 %v3165_v2, %s3238_s19 }
0x14d9   :  { %2288 = vrot.lane.b32.xlu1 %v3167_v4, %s3238_s19 }
0x154a   :  { %v2193_v6 = vpop.permute.xlu0 %2192 }
0x154b   :  { %v2195_v8 = vmul.f32 %v3161_v39, %v2193_v6  ;;  %v2289_v11 = vpop.permute.xlu1 %2288 }
0x154c   :  { %v2291_v12 = vmul.f32 %v3163_v40, %v2289_v11 }
0x154d   :  { %2293 = vrot.lane.b32.xlu0 %v2195_v8, %s3239_s4 }
0x154e   :  { %2368 = vrot.lane.b32.xlu1 %v2291_v12, %s3239_s4 }
0x15bf   :  { %v2294_v13 = vpop.permute.xlu0 %2293 }
0x15c0   :  { %v2369_v14 = vpop.permute.xlu1 %2368  ;;  %3015 = vmatmul.mubr.msk.f32.vlgmr.msra.gmra.mxu1 %vm301_vm3, %v2294_v13 }
0x15c1   :  { %3026 = vmatmul.mubr.msk.f32.vlgmr.msra.gmra.mxu0 %vm301_vm3, %v2369_v14  ;;  %3036 = vmatprep.mubr.msk.f32.mxu1 %vm3236_vm0, %v3235_v0 }
0x15c2   :  { %3029 = vmatpush3.msra.mxu1 %v2470_v31 }
0x15c3   :  { %3030 = vmatprep.subr.mxu1 %v3235_v0 }
0x15c4   :  { %3031 = vmatpush3.msra.mxu1 %v2469_v34 }
0x15c5   :  { %3032 = vmatprep.subr.mxu1 %v3235_v0 }
0x15c6   :  { %3033 = vmatpush3.msra.mxu1 %v2468_v41 }
0x15c7   :  { %3034 = vmatprep.subr.mxu1 %v3235_v0 }
0x15c8   :  { %3035 = vmatpush3.msra.mxu1 %v2467_v42 }
0x1680   :  { %v2363_v17 = vpop.f32.mrf.mxu1 }
0x1681   :  { %v2438_v18 = vpop.f32.mrf.mxu0 }
0x1682   :  { %v2439_v16 = vadd.f32 %v2438_v18, %v2363_v17  ;;  %v3016_v10 = vpop.f32.mrf.mxu1 }
0x1683   :  { %v3027_v19 = vpop.f32.mrf.mxu0 }
0x1684   :  { %v2442_v20 = vadd.f32 %v3189_v54, %v2439_v16 }
0x1686   :  { %3168 = vtanh.f32 %v2442_v20  ;;  %v2626_v22 = vmul.f32 -1.442695, %v2442_v20 }
0x1688   :  { %3170 = vpow2.f32 %v2626_v22 }
0x1693   :  { %v3169_v21 = vpop.eup %3168 }
0x1694   :  { %2452 = vrot.lane.b32.xlu0 %v3169_v21, %s3238_s19 }
0x1695   :  { %v3171_v23 = vpop.eup %3170 }
0x1696   :  { %v2446_v24 = vadd.f32 1.0, %v3171_v23 }
0x1698   :  { %3172 = vrcp.f32 %v2446_v24 }
0x16a5   :  { %v3173_v25 = vpop.eup %3172 }
0x16a6   :  { %v2450_v28 = vmul.f32 %v3173_v25, %v2189_v7 }
0x1706   :  { %v2453_v26 = vpop.permute.xlu0 %2452 }
0x1707   :  { %v2455_v27 = vmul.f32 %v3173_v25, %v2453_v26 }
0x1709   :  { %2457 = vrot.lane.b32.xlu1 %v2455_v27, %s3239_s4 }
0x177b   :  { %v2458_v29 = vpop.permute.xlu1 %2457 }
0x177c   :  { %v2460_v30 = vadd.f32 %v2458_v29, %v2450_v28 }
0x177e   :  { %3174 = vtanh.f32 %v2460_v30 }
0x178b   :  { %v3175_v43 = vpop.eup %3174 }
0x178c   :  { %2463 = vrot.lane.b32.xlu0 %v3175_v43, %s3238_s19  ;;  %s3210_s19 = scalar_lea.vmem %s2562_s9, 128 }
0x178d   :  { %p3211_p5 = scmp.ne.s32.totalorder %s2562_s9, %s3210_s19  ;;  %p3216_p7 = scmp.lt.s32.totalorder %s3210_s19, %s3210_s19 }
0x178f   :  { %p3217_p8 = por %p3216_p7, %p3215_p6 }
0x1791   :  { %p3218_p9 = pnand %p3217_p8, %p3211_p5 }
0x17fe   :  { %v2464_v44 = vpop.permute.xlu0 %2463 }
0x17ff   :  { %v2466_v45 = vmul.f32 %v3173_v25, %v2464_v44 }
0x1801   :  { %2479 = vrot.lane.b32.xlu1 %v2466_v45, %s3239_s4 }
0x1873   :  { %v2480_v46 = vpop.permute.xlu1 %2479 }
0x1874   :  { %3037 = vmatmul.mubr.msk.f32.vlgmr.msra.gmra.mxu1 %vm301_vm3, %v2480_v46 }
0x1934   :  { %v2549_v48 = vpop.f32.mrf.mxu1 }
0x1935   :  { %v2550_v0 = vadd.f32 %v2627_v47, %v2549_v48 }
0x1936   :  { %v3038_v50 = vpop.f32.mrf.mxu1 }
0x1937   :  { %2554 = vst.msk [vmem:[#allocation6] sm:$0xff] %vm2553_vm4, %v2550_v0 }
0x1938   :  { %3221 = shalt.err (!%p3218_p9)
}
0x1939   :  { %2564 = dma.vmem_to_hbm [thread:$0]  %s2562_s9, 128, %s3894_s11, [#allocation5]  }
0x193a   :  { %3232 = dma.done.wait [#allocation5], 128  }
0x193b   :  { %3233 = vsyncadd [#allocation5], 4294967168 }
0x193c   :  { %2568 = vsyncpa [#allocation4], 1 }
0x193d   :  { %2569 = vsyncpa [#allocation5], 1 }

</bundles_post_ra>
